<compile_context>
chip_gen: v7x
topology: tpu7x:2x2x1
jax: 0.10.0
libtpu: 0.0.40
codegen_flags: <defaults>
</compile_context>

<pallas_src>
import functools

import jax
import jax.numpy as jnp
from jax import lax
from jax.experimental import pallas as pl
from jax.experimental.pallas import tpu as pltpu


def _round_up(x: int, m: int) -> int:
    return ((x + m - 1) // m) * m


def _vmem_capacity_bytes() -> int:
    """Per-TensorCore physical VMEM, with a safe fallback (v5e/v6e = 128 MiB)."""
    try:
        info = pltpu.get_tpu_info()
        return int(getattr(info, "vmem_capacity_bytes", 128 << 20))
    except Exception:
        return 128 << 20


def _normal_loss_kernel(scores_ref, labels_ref, out_ref, *, inner, bs, apply_mask):
    c = pl.program_id(0)   # core-split axis ("parallel")
    i = pl.program_id(1)   # batch-block axis ("arbitrary", resident accumulator)

    # Zero this core's resident (1,1,1) accumulator block at its first step.
    @pl.when(i == 0)
    def _init():
        out_ref[...] = jnp.zeros_like(out_ref)

    tb, pre_k = scores_ref.shape
    g = tb // 128

    # Row-max over pre_k in native dtype; produce it lane-dense as (g, 128) so the
    # transcendental tail below runs on full vregs instead of 1-of-128 lanes.
    s = scores_ref[...].reshape(g, 128, pre_k)                # free leading-dim split
    m = jnp.max(s, axis=-1).astype(jnp.float32)               # (g, 128) lane-dense
    y = labels_ref[0]                                         # (g, 128) f32, lane-dense

    # BCE matching torch.nn.BCELoss (log terms clamped at -100).
    log_m = jnp.maximum(jnp.log(m), jnp.float32(-100.0))
    log_1m = jnp.maximum(jnp.log(1.0 - m), jnp.float32(-100.0))
    per = -(y * log_m + (1.0 - y) * log_1m)                   # (g, 128)

    if apply_mask:
        # Global (nominal) row index of each element; rows >= bs are padding of the
        # partial last block or a clamped duplicate block -> contribute zero.
        gb = c * inner + i
        row = (gb * tb
               + lax.broadcasted_iota(jnp.int32, (g, 128), 0) * 128
               + lax.broadcasted_iota(jnp.int32, (g, 128), 1))
        per = jnp.where(row < bs, per, jnp.float32(0.0))

    psum = jnp.sum(jnp.sum(per, axis=1, keepdims=True), axis=0, keepdims=True)  # (1,1)
    out_ref[...] = out_ref[...] + psum   # broadcasts into the (1,1,1) block


def normal_loss(scores: jax.Array, labels: jax.Array, *, block_rows=None) -> jax.Array:
    """scores: [bs, pre_k] probabilities (f32 or bf16); labels: [bs] targets in [0,1]."""
    bs, pre_k = scores.shape
    itemsize = jnp.dtype(scores.dtype).itemsize
    labels_f = labels.reshape(-1).astype(jnp.float32)

    # Tiny batches are padded to one 128-row block (negligible copy); big batches are
    # never copied -- the partial last block is handled by masking inside the kernel.
    if bs < 128:
        scores_arr = jnp.pad(scores, ((0, 128 - bs), (0, 0)))
        bs_arr = 128
    else:
        scores_arr = scores
        bs_arr = bs

    # --- per-generation block sizing (feedback items 1/2/9) -------------------------
    vmem_cap = _vmem_capacity_bytes()
    target_block_bytes = (8 << 20) if vmem_cap <= (64 << 20) else (12 << 20)
    row_vmem_bytes = _round_up(pre_k, 128) * itemsize          # lane-padded VMEM bytes/row
    if block_rows is None:
        block_rows = target_block_bytes // row_vmem_bytes
    tb = max(128, (int(block_rows) // 128) * 128)              # multiple of 128 covers
    tb = min(tb, (bs_arr // 128) * 128)                        # 8/16/32 sublane packing

    nb_total = -(-bs_arr // tb)                                # batch blocks (last may be partial)
    ncores = 2 if nb_total >= 2 else 1                         # 2-way split: real on v7x, no-op loop on v5e/v6e
    inner = -(-nb_total // ncores)
    apply_mask = (ncores * inner * tb != bs)                   # static: skip mask when exact

    # Labels: lane-dense (nb_total, tb/128, 128) layout (cheap pad of a tiny array).
    lp = nb_total * tb
    labels_p = jnp.pad(labels_f, (0, lp - bs)).reshape(nb_total, tb // 128, 128)

    def blk_idx(c, i):
        # Clamp out-of-range (duplicate) blocks of the uneven split; their rows are
        # nominally >= bs so the in-kernel mask zeroes their contribution.
        return jnp.minimum(c * inner + i, nb_total - 1)

    scores_spec = pl.BlockSpec((tb, pre_k), lambda c, i: (blk_idx(c, i), 0))
    labels_spec = pl.BlockSpec((1, tb // 128, 128), lambda c, i: (blk_idx(c, i), 0, 0))
    out_spec = pl.BlockSpec((1, 1, 1), lambda c, i: (c, 0, 0))  # resident per-core accumulator

    scores_blk_vmem = tb * row_vmem_bytes
    labels_blk_vmem = tb * 4
    vmem_limit = 2 * (scores_blk_vmem + labels_blk_vmem) + (4 << 20)
    vmem_limit = int(min(max(vmem_limit, 20 << 20), vmem_cap * 3 // 4))

    cost = pl.CostEstimate(
        flops=int(bs) * int(pre_k) + 10 * int(bs),
        transcendentals=2 * int(bs),
        bytes_accessed=int(bs) * int(pre_k) * itemsize + int(bs) * 4 + ncores * 4,
    )

    kernel = functools.partial(_normal_loss_kernel, inner=inner, bs=bs,
                               apply_mask=apply_mask)

    partial_sums = pl.pallas_call(
        kernel,
        out_shape=jax.ShapeDtypeStruct((ncores, 1, 1), jnp.float32),
        grid_spec=pltpu.PrefetchScalarGridSpec(
            num_scalar_prefetch=0,
            grid=(ncores, inner),
            in_specs=[scores_spec, labels_spec],
            out_specs=out_spec,
        ),
        compiler_params=pltpu.CompilerParams(
            dimension_semantics=("parallel", "arbitrary"),
            vmem_limit_bytes=vmem_limit,
        ),
        cost_estimate=cost,
    )(scores_arr, labels_p)

    # TODO(synk): when pre_k << 128, folding 128//pre_k rows into the lane dim would
    # further cut VMEM lane-padding; skipped (needs a segmented in-kernel max).
    return jnp.sum(partial_sums) / jnp.float32(bs)


def _reference(scores, labels):
    m = jnp.max(scores.astype(jnp.float32), axis=-1)
    log_m = jnp.maximum(jnp.log(m), -100.0)
    log_1m = jnp.maximum(jnp.log(1.0 - m), -100.0)
    return jnp.mean(-(labels * log_m + (1.0 - labels) * log_1m))


if __name__ == "__main__":
    key = jax.random.PRNGKey(0)
    k1, k2, k3, k4, k5, k6 = jax.random.split(key, 6)

    # Case 1: tiny batch (padded single-block path, mask active).
    bs, pre_k = 8, 32
    scores = jax.nn.sigmoid(jax.random.normal(k1, (bs, pre_k), jnp.float32))
    labels = (jax.random.uniform(k2, (bs,)) > 0.5).astype(jnp.float32)
    out = normal_loss(scores, labels)
    jax.block_until_ready(out)
    ref = _reference(scores, labels)
    assert jnp.allclose(out, ref, atol=1e-5, rtol=1e-5), (out, ref)

    # Case 2: multi-block grid (2x2), uneven core split -> clamped duplicate block
    # plus a partial last block, both handled by the row mask.
    bs2, pre_k2 = 640, 32
    scores2 = jax.nn.sigmoid(jax.random.normal(k3, (bs2, pre_k2), jnp.float32))
    labels2 = (jax.random.uniform(k4, (bs2,)) > 0.5).astype(jnp.float32)
    out2 = normal_loss(scores2, labels2, block_rows=256)
    jax.block_until_ready(out2)
    ref2 = _reference(scores2, labels2)
    assert jnp.allclose(out2, ref2, atol=1e-5, rtol=1e-5), (out2, ref2)

    # Case 3: bf16 scores, exact 2-way split, mask statically elided.
    bs3, pre_k3 = 256, 32
    scores3 = jax.nn.sigmoid(
        jax.random.normal(k5, (bs3, pre_k3), jnp.float32)).astype(jnp.bfloat16)
    labels3 = (jax.random.uniform(k6, (bs3,)) > 0.5).astype(jnp.float32)
    out3 = normal_loss(scores3, labels3, block_rows=128)
    jax.block_until_ready(out3)
    ref3 = _reference(scores3, labels3)
    assert jnp.allclose(out3, ref3, atol=1e-5, rtol=1e-5), (out3, ref3)

    print("KERNEL_OK")
</pallas_src>

<mosaic_0001>
module attributes {stable_mosaic.version = 11 : i64} {
  func.func @_normal_loss_kernel(%arg0: i32, %arg1: i32, %arg2: memref<128x32xf32, #tpu.memory_space<vmem>>, %arg3: memref<1x1x128xf32, #tpu.memory_space<vmem>>, %arg4: memref<1x1x1xf32, #tpu.memory_space<vmem>>) attributes {dimension_semantics = [#tpu.dimension_semantics<parallel>, #tpu.dimension_semantics<arbitrary>], iteration_bounds = array<i64: 1, 1>, scalar_prefetch = 0 : i64, scratch_operands = 0 : i64, tpu.core_type = #tpu.core_type<tc>, window_params = [{transform_indices = @transform_0, window_bounds = array<i64: 128, 32>}, {transform_indices = @transform_1, window_bounds = array<i64: 1, 1, 128>}, {transform_indices = @transform_2, window_bounds = array<i64: 1, 1, 1>}]} {
    %c0_i32 = arith.constant 0 : i32
    %0 = arith.cmpi eq, %arg1, %c0_i32 : i32
    %1 = arith.extui %0 : i1 to i32
    %c0_i32_0 = arith.constant 0 : i32
    %2 = arith.cmpi ne, %1, %c0_i32_0 : i32
    scf.if %2 {
      %cst_20 = arith.constant 0.000000e+00 : f32
      %45 = vector.broadcast %cst_20 : f32 to vector<1x1x1xf32>
      %c0_21 = arith.constant 0 : index
      %c0_22 = arith.constant 0 : index
      %c0_23 = arith.constant 0 : index
      %46 = vector.load %arg4[%c0_21, %c0_22, %c0_23] : memref<1x1x1xf32, #tpu.memory_space<vmem>>, vector<1x1x1xf32>
      tpu.vector_store %arg4[%c0_21, %c0_22, %c0_23], %45 {strides = array<i32>} : memref<1x1x1xf32, #tpu.memory_space<vmem>>, vector<1x1x1xf32>,
    } else {
    }
    %c0 = arith.constant 0 : index
    %c0_1 = arith.constant 0 : index
    %3 = vector.load %arg2[%c0, %c0_1] : memref<128x32xf32, #tpu.memory_space<vmem>>, vector<128x32xf32>
    %4 = vector.shape_cast %3 : vector<128x32xf32> to vector<1x128x32xf32>
    %cst = arith.constant dense<0xFF800000> : vector<1x128xf32>
    %5 = vector.multi_reduction <maximumf>, %4, %cst [2] : vector<1x128x32xf32> to vector<1x128xf32>
    %c0_2 = arith.constant 0 : index
    %c0_3 = arith.constant 0 : index
    %c0_4 = arith.constant 0 : index
    %6 = vector.load %arg3[%c0_2, %c0_3, %c0_4] : memref<1x1x128xf32, #tpu.memory_space<vmem>>, vector<1x1x128xf32>
    %7 = vector.shape_cast %6 : vector<1x1x128xf32> to vector<1x128xf32>
    %8 = math.log %5 : vector<1x128xf32>
    %cst_5 = arith.constant -1.000000e+02 : f32
    %9 = vector.broadcast %cst_5 : f32 to vector<1x128xf32>
    %10 = arith.maximumf %8, %9 : vector<1x128xf32>
    %cst_6 = arith.constant 1.000000e+00 : f32
    %11 = vector.broadcast %cst_6 : f32 to vector<1x128xf32>
    %12 = arith.subf %11, %5 : vector<1x128xf32>
    %13 = math.log %12 : vector<1x128xf32>
    %cst_7 = arith.constant -1.000000e+02 : f32
    %14 = vector.broadcast %cst_7 : f32 to vector<1x128xf32>
    %15 = arith.maximumf %13, %14 : vector<1x128xf32>
    %16 = arith.mulf %7, %10 : vector<1x128xf32>
    %cst_8 = arith.constant 1.000000e+00 : f32
    %17 = vector.broadcast %cst_8 : f32 to vector<1x128xf32>
    %18 = arith.subf %17, %7 : vector<1x128xf32>
    %19 = arith.mulf %18, %15 : vector<1x128xf32>
    %20 = arith.addf %16, %19 : vector<1x128xf32>
    %cst_9 = arith.constant 0.000000e+00 : f32
    %21 = vector.broadcast %cst_9 : f32 to vector<1x128xf32>
    %22 = arith.subf %21, %20 : vector<1x128xf32>
    %c1_i32 = arith.constant 1 : i32
    %23 = arith.muli %arg0, %c1_i32 : i32
    %24 = arith.addi %23, %arg1 : i32
    %c128_i32 = arith.constant 128 : i32
    %25 = arith.muli %24, %c128_i32 : i32
    %26 = tpu.iota {dimensions = array<i32: 0>} : vector<1x128xi32>
    %c128_i32_10 = arith.constant 128 : i32
    %27 = vector.broadcast %c128_i32_10 : i32 to vector<1x128xi32>
    %28 = arith.muli %26, %27 : vector<1x128xi32>
    %29 = vector.broadcast %25 : i32 to vector<1x128xi32>
    %30 = arith.addi %29, %28 : vector<1x128xi32>
    %31 = tpu.iota {dimensions = array<i32: 1>} : vector<1x128xi32>
    %32 = arith.addi %30, %31 : vector<1x128xi32>
    %c8_i32 = arith.constant 8 : i32
    %33 = vector.broadcast %c8_i32 : i32 to vector<1x128xi32>
    %34 = arith.cmpi slt, %32, %33 : vector<1x128xi32>
    %cst_11 = arith.constant 0.000000e+00 : f32
    %35 = vector.broadcast %cst_11 : f32 to vector<1x128xf32>
    %36 = arith.select %34, %22, %35 : vector<1x128xi1>, vector<1x128xf32>
    %cst_12 = arith.constant dense<0.000000e+00> : vector<1xf32>
    %37 = vector.multi_reduction <add>, %36, %cst_12 [1] : vector<1x128xf32> to vector<1xf32>
    %38 = vector.shape_cast %37 : vector<1xf32> to vector<1x1xf32>
    %cst_13 = arith.constant dense<0.000000e+00> : vector<1xf32>
    %39 = vector.multi_reduction <add>, %38, %cst_13 [0] : vector<1x1xf32> to vector<1xf32>
    %40 = vector.shape_cast %39 : vector<1xf32> to vector<1x1xf32>
    %c0_14 = arith.constant 0 : index
    %c0_15 = arith.constant 0 : index
    %c0_16 = arith.constant 0 : index
    %41 = vector.load %arg4[%c0_14, %c0_15, %c0_16] : memref<1x1x1xf32, #tpu.memory_space<vmem>>, vector<1x1x1xf32>
    %42 = vector.shape_cast %40 : vector<1x1xf32> to vector<1x1x1xf32>
    %43 = arith.addf %41, %42 : vector<1x1x1xf32>
    %c0_17 = arith.constant 0 : index
    %c0_18 = arith.constant 0 : index
    %c0_19 = arith.constant 0 : index
    %44 = vector.load %arg4[%c0_17, %c0_18, %c0_19] : memref<1x1x1xf32, #tpu.memory_space<vmem>>, vector<1x1x1xf32>
    tpu.vector_store %arg4[%c0_17, %c0_18, %c0_19], %43 {strides = array<i32>} : memref<1x1x1xf32, #tpu.memory_space<vmem>>, vector<1x1x1xf32>,
    return
  }
  func.func @transform_0(%arg0: i32, %arg1: i32) -> (i32, i32) {
    %c1_i32 = arith.constant 1 : i32
    %0 = arith.muli %arg0, %c1_i32 : i32
    %1 = arith.addi %0, %arg1 : i32
    %c0_i32 = arith.constant 0 : i32
    %2 = arith.minsi %1, %c0_i32 : i32
    %c0_i32_0 = arith.constant 0 : i32
    %c0_i32_1 = arith.constant 0 : i32
    return %2, %c0_i32_0 : i32, i32
  }
  func.func @transform_1(%arg0: i32, %arg1: i32) -> (i32, i32, i32) {
    %c1_i32 = arith.constant 1 : i32
    %0 = arith.muli %arg0, %c1_i32 : i32
    %1 = arith.addi %0, %arg1 : i32
    %c0_i32 = arith.constant 0 : i32
    %2 = arith.minsi %1, %c0_i32 : i32
    %c0_i32_0 = arith.constant 0 : i32
    %c0_i32_1 = arith.constant 0 : i32
    %c0_i32_2 = arith.constant 0 : i32
    return %2, %c0_i32_0, %c0_i32_1 : i32, i32, i32
  }
  func.func @transform_2(%arg0: i32, %arg1: i32) -> (i32, i32, i32) {
    %c0_i32 = arith.constant 0 : i32
    %c0_i32_0 = arith.constant 0 : i32
    %c0_i32_1 = arith.constant 0 : i32
    return %arg0, %c0_i32, %c0_i32_0 : i32, i32, i32
  }
}

</mosaic_0001>

<bundles_post_ra>
// kernel: tpu_custom_call.1
= control target key start
LH: loop header
LB: loop body
LE: loop exit
PB: predicated region body
PF: predicated region fallthrough
CT: control target
= control target key end

     0   :  { %vm90_vm0 = vcmask 261120   ;;  %s4344_s0 = inlined_call_operand.vmem [shape: f32[128,32], index: 0, kind: input, shape index: {}]   ;;  %s4345_s1 = inlined_call_operand.vmem [shape: f32[1,1,128], index: 1, kind: input, shape index: {}]   ;;  %s4346_s2 = inlined_call_operand.hbm [shape: f32[1,1,1], index: 2, kind: output, shape index: {}]  }
   0x1   :  { %v74_v0 = vld [vmem:[%s4344_s0] sm:$0xff]  ;;  %v76_v1 = vld [vmem:[%s4344_s0 + $0x10] sm:$0xff]  ;;  %v75_v2 = vld [vmem:[%s4344_s0 + $0x8] sm:$0xff] }
   0x2   :  { %v91_v3 = vsel %vm90_vm0, %v74_v0, -inf  ;;  %v97_v4 = vsel %vm90_vm0, %v76_v1, -inf  ;;  %v77_v5 = vld [vmem:[%s4344_s0 + $0x18] sm:$0xff]  ;;  %v94_v6 = vsel %vm90_vm0, %v75_v2, -inf  ;;  %v78_v8 = vld [vmem:[%s4344_s0 + $0x20] sm:$0xff]  ;;  %v79_v9 = vld [vmem:[%s4344_s0 + $0x28] sm:$0xff] }
   0x3   :  { %92 = vmax.xlane.f32.xlu0 %v91_v3  ;;  %98 = vmax.xlane.f32.xlu1 %v97_v4  ;;  %v100_v7 = vsel %vm90_vm0, %v77_v5, -inf }
   0x4   :  { %7 = vsyncpa [#allocation3], 0  ;;  %v103_v10 = vsel %vm90_vm0, %v78_v8, -inf  ;;  %v106_v11 = vsel %vm90_vm0, %v79_v9, -inf  ;;  %v80_v12 = vld [vmem:[%s4344_s0 + $0x30] sm:$0xff]  ;;  %v81_v13 = vld [vmem:[%s4344_s0 + $0x38] sm:$0xff]  ;;  %v268_v37 = vlaneseq }
   0x5   :  { %v109_v14 = vsel %vm90_vm0, %v80_v12, -inf  ;;  %v112_v15 = vsel %vm90_vm0, %v81_v13, -inf  ;;  %v82_v16 = vld [vmem:[%s4344_s0 + $0x40] sm:$0xff]  ;;  %v83_v17 = vld [vmem:[%s4344_s0 + $0x48] sm:$0xff]  ;;  %v84_v20 = vld [vmem:[%s4344_s0 + $0x50] sm:$0xff]  ;;  %v3333_v32 = vmov 0  }
   0x6   :  { %v115_v18 = vsel %vm90_vm0, %v82_v16, -inf  ;;  %v118_v19 = vsel %vm90_vm0, %v83_v17, -inf  ;;  %v85_v21 = vld [vmem:[%s4344_s0 + $0x58] sm:$0xff]  ;;  %v121_v22 = vsel %vm90_vm0, %v84_v20, -inf  ;;  %v86_v24 = vld [vmem:[%s4344_s0 + $0x60] sm:$0xff]  ;;  %v87_v25 = vld [vmem:[%s4344_s0 + $0x68] sm:$0xff]  ;;  %3243 = vset.pattern.permute.xlu0 %v3333_v32  ;;  %3244 = vset.pattern.permute.xlu1 %v3333_v32 }
   0x7   :  { %95 = vmax.xlane.f32.xlu0 %v94_v6  ;;  %101 = vmax.xlane.f32.xlu1 %v100_v7  ;;  %v124_v23 = vsel %vm90_vm0, %v85_v21, -inf  ;;  %v127_v26 = vsel %vm90_vm0, %v86_v24, -inf  ;;  %v130_v27 = vsel %vm90_vm0, %v87_v25, -inf  ;;  %v88_v28 = vld [vmem:[%s4344_s0 + $0x70] sm:$0xff]  ;;  %v89_v29 = vld [vmem:[%s4344_s0 + $0x78] sm:$0xff]  ;;  %v3417_v42 = vshrl.u32 %v268_v37, 7 }
   0x8   :  { %v133_v30 = vsel %vm90_vm0, %v88_v28, -inf  ;;  %v136_v31 = vsel %vm90_vm0, %v89_v29, -inf  ;;  %v3334_v43 = vmov 1966171168   ;;  %vm1623_vm1 = vcmask 130112  }
   0x9   :  { %v785_v44 = vunpack.c.l.s4 %v3334_v43  ;;  %v3420_v49 = vsub.s32 0, %v3417_v42  ;;  %v3423_v50 = vsub.s32 1, %v3417_v42  ;;  %v3426_v51 = vsub.s32 2, %v3417_v42 }
   0xa   :  { %v3429_v53 = vsub.s32 3, %v3417_v42  ;;  %v3432_v54 = vsub.s32 4, %v3417_v42  ;;  %v3435_v60 = vsub.s32 5, %v3417_v42  ;;  %v3438_v61 = vsub.s32 6, %v3417_v42 }
   0xb   :  { %104 = vmax.xlane.f32.xlu0 %v103_v10  ;;  %107 = vmax.xlane.f32.xlu1 %v106_v11  ;;  %v786_v55 = vunpack.c.0.s8 %v785_v44  ;;  %v3441_v5 = vsub.s32 7, %v3417_v42  ;;  %vm1630_vm2 = vcmask 195712   ;;  %vm1637_vm3 = vcmask 261312  }
   0xc   :  { %vm1644_vm4 = vcmask 326912   ;;  %vm1651_vm5 = vcmask 392512   ;;  %vm1658_vm6 = vcmask 458112   ;;  %vm1665_vm7 = vcmask 523712  }
   0xd   :  { %v3446_v9 = vsub.s32 %v786_v55, %v3417_v42  ;;  %vm1672_vm8 = vcmask 589312   ;;  %vm1679_vm9 = vcmask 654912   ;;  %vm1686_vm10 = vcmask 720512  }
   0xe   :  { %vm1693_vm11 = vcmask 786112   ;;  %vm1700_vm12 = vcmask 851712   ;;  %vm1707_vm13 = vcmask 917312   ;;  %vm1714_vm14 = vcmask 982912  }
   0xf   :  { %110 = vmax.xlane.f32.xlu0 %v109_v14  ;;  %113 = vmax.xlane.f32.xlu1 %v112_v15  ;;  %vm1721_vm15 = vcmask 1048512  }
  0x13   :  { %116 = vmax.xlane.f32.xlu0 %v115_v18  ;;  %119 = vmax.xlane.f32.xlu1 %v118_v19 }
  0x17   :  { %122 = vmax.xlane.f32.xlu0 %v121_v22  ;;  %125 = vmax.xlane.f32.xlu1 %v124_v23 }
  0x1b   :  { %128 = vmax.xlane.f32.xlu0 %v127_v26  ;;  %131 = vmax.xlane.f32.xlu1 %v130_v27 }
  0x1f   :  { %134 = vmax.xlane.f32.xlu0 %v133_v30  ;;  %137 = vmax.xlane.f32.xlu1 %v136_v31 }
  0x90   :  { %v93_v33 = vpop.xlane.xlu0 %92  ;;  %v99_v34 = vpop.xlane.xlu1 %98 }
  0x91   :  { %3245 = vlog2.f32 %v93_v33  ;;  %v188_v35 = vsub.f32 1.0, %v93_v33  ;;  %v190_v36 = vsub.f32 1.0, %v99_v34 }
  0x92   :  { %3247 = vlog2.f32 %v99_v34 }
  0x93   :  { %3249 = vlog2.f32 %v188_v35 }
  0x94   :  { %3251 = vlog2.f32 %v190_v36  ;;  %v96_v38 = vpop.xlane.xlu0 %95  ;;  %v102_v39 = vpop.xlane.xlu1 %101 }
  0x95   :  { %3253 = vlog2.f32 %v96_v38  ;;  %v189_v40 = vsub.f32 1.0, %v96_v38  ;;  %v191_v41 = vsub.f32 1.0, %v102_v39 }
  0x96   :  { %3255 = vlog2.f32 %v102_v39 }
  0x97   :  { %3257 = vlog2.f32 %v189_v40 }
  0x98   :  { %3259 = vlog2.f32 %v191_v41  ;;  %v105_v45 = vpop.xlane.xlu0 %104  ;;  %v108_v46 = vpop.xlane.xlu1 %107 }
  0x99   :  { %3261 = vlog2.f32 %v105_v45  ;;  %v192_v47 = vsub.f32 1.0, %v105_v45  ;;  %v193_v48 = vsub.f32 1.0, %v108_v46 }
  0x9a   :  { %3263 = vlog2.f32 %v108_v46 }
  0x9b   :  { %v3246_v52 = vpop.eup %3245  ;;  %3265 = vlog2.f32 %v192_v47 }
  0x9c   :  { %v3248_v56 = vpop.eup %3247  ;;  %v141_v57 = vmul.f32 0.6931472, %v3246_v52  ;;  %3267 = vlog2.f32 %v193_v48  ;;  %v111_v58 = vpop.xlane.xlu0 %110 }
  0x9d   :  { %v114_v59 = vpop.xlane.xlu1 %113  ;;  %v3250_v62 = vpop.eup %3249  ;;  %v145_v63 = vmul.f32 0.6931472, %v3248_v56  ;;  %3269 = vlog2.f32 %v111_v58  ;;  %v194_v0 = vsub.f32 1.0, %v111_v58 }
  0x9e   :  { %v195_v1 = vsub.f32 1.0, %v114_v59  ;;  %v3252_v2 = vpop.eup %3251  ;;  %v172_v3 = vmax.f32 %v141_v57, -100.0  ;;  %v205_v4 = vmul.f32 0.6931472, %v3250_v62  ;;  %3271 = vlog2.f32 %v114_v59 }
  0x9f   :  { %v3254_v6 = vpop.eup %3253  ;;  %v3443_v7 = vmax.f32 %v145_v63, -100.0  ;;  %v209_v8 = vmul.f32 0.6931472, %v3252_v2  ;;  %3273 = vlog2.f32 %v194_v0 }
  0xa0   :  { %v3256_v10 = vpop.eup %3255  ;;  %v3448_v11 = vmax.f32 %v205_v4, -100.0  ;;  %v143_v12 = vmul.f32 0.6931472, %v3254_v6  ;;  %3275 = vlog2.f32 %v195_v1  ;;  %v117_v13 = vpop.xlane.xlu0 %116  ;;  %v271_v15 = vrot.slane %v172_v3, %v3420_v49 }
  0xa1   :  { %v120_v14 = vpop.xlane.xlu1 %119  ;;  %v3258_v16 = vpop.eup %3257  ;;  %v3451_v17 = vmax.f32 %v209_v8, -100.0  ;;  %v147_v18 = vmul.f32 0.6931472, %v3256_v10  ;;  %3277 = vlog2.f32 %v117_v13  ;;  %v196_v19 = vsub.f32 1.0, %v117_v13 }
  0xa2   :  { %v3260_v20 = vpop.eup %3259  ;;  %v3453_v21 = vmax.f32 %v143_v12, -100.0  ;;  %v207_v22 = vmul.f32 0.6931472, %v3258_v16  ;;  %3279 = vlog2.f32 %v120_v14  ;;  %v197_v23 = vsub.f32 1.0, %v120_v14 }
  0xa3   :  { %v3262_v24 = vpop.eup %3261  ;;  %v3455_v25 = vmax.f32 %v147_v18, -100.0  ;;  %v211_v26 = vmul.f32 0.6931472, %v3260_v20  ;;  %3281 = vlog2.f32 %v196_v19  ;;  %v275_v27 = vrot.slane %v172_v3, %v3423_v50 }
  0xa4   :  { %v3264_v28 = vpop.eup %3263  ;;  %v3458_v29 = vmax.f32 %v207_v22, -100.0  ;;  %v149_v30 = vmul.f32 0.6931472, %v3262_v24  ;;  %3283 = vlog2.f32 %v197_v23  ;;  %v279_v31 = vrot.slane %v172_v3, %v3426_v51 }
  0xa5   :  { %v3266_v32 = vpop.eup %3265  ;;  %v3461_v33 = vmax.f32 %v211_v26, -100.0  ;;  %v151_v34 = vmul.f32 0.6931472, %v3264_v28  ;;  %v283_v35 = vrot.slane %v172_v3, %v3429_v53  ;;  %v287_v36 = vrot.slane %v172_v3, %v3432_v54 }
  0xa6   :  { %v3268_v38 = vpop.eup %3267  ;;  %v3465_v39 = vmax.f32 %v149_v30, -100.0  ;;  %v213_v40 = vmul.f32 0.6931472, %v3266_v32  ;;  %v291_v41 = vrot.slane %v172_v3, %v3435_v60  ;;  %v295_v43 = vrot.slane %v172_v3, %v3438_v61 }
  0xa7   :  { %v3270_v44 = vpop.eup %3269  ;;  %v3469_v45 = vmax.f32 %v151_v34, -100.0  ;;  %v215_v46 = vmul.f32 0.6931472, %v3268_v38  ;;  %v299_v47 = vrot.slane %v172_v3, %v3441_v5  ;;  %v780_v48 = vcombine.low %v271_v15, %v275_v27 }
  0xa8   :  { %v3272_v52 = vpop.eup %3271  ;;  %v3472_v55 = vmax.f32 %v213_v40, -100.0  ;;  %v153_v56 = vmul.f32 0.6931472, %v3270_v44  ;;  %v781_v57 = vcombine.low %v279_v31, %v283_v35  ;;  %v782_v58 = vcombine.low %v287_v36, %v291_v41 }
  0xa9   :  { %v3274_v59 = vpop.eup %3273  ;;  %v3474_v62 = vmax.f32 %v215_v46, -100.0  ;;  %v155_v63 = vmul.f32 0.6931472, %v3272_v52  ;;  %v783_v0 = vcombine.low %v295_v43, %v299_v47  ;;  %v790_v1 = vrot.slane %v780_v48, %v3446_v9  ;;  %v123_v43 = vpop.xlane.xlu0 %122 }
  0xaa   :  { %v3276_v2 = vpop.eup %3275  ;;  %v3477_v4 = vmax.f32 %v153_v56, -100.0  ;;  %v217_v6 = vmul.f32 0.6931472, %v3274_v59  ;;  %v797_v3 = vrot.slane %v781_v57, %v3446_v9  ;;  %v804_v8 = vrot.slane %v782_v58, %v3446_v9  ;;  %v126_v52 = vpop.xlane.xlu1 %125 }
  0xab   :  { %v3278_v10 = vpop.eup %3277  ;;  %v3481_v12 = vmax.f32 %v155_v63, -100.0  ;;  %v219_v13 = vmul.f32 0.6931472, %v3276_v2  ;;  %v811_v14 = vrot.slane %v783_v0, %v3446_v9  ;;  %v303_v15 = vrot.slane %v3453_v21, %v3420_v49 }
  0xac   :  { %v3280_v16 = vpop.eup %3279  ;;  %v3486_v18 = vmax.f32 %v217_v6, -100.0  ;;  %v157_v19 = vmul.f32 0.6931472, %v3278_v10  ;;  %v812_v20 = vcombine.low %v790_v1, %v797_v3  ;;  %v307_v22 = vrot.slane %v3453_v21, %v3423_v50 }
  0xad   :  { %v3282_v23 = vpop.eup %3281  ;;  %v3490_v24 = vmax.f32 %v219_v13, -100.0  ;;  %v159_v26 = vmul.f32 0.6931472, %v3280_v16  ;;  %v813_v27 = vcombine.low %v804_v8, %v811_v14  ;;  %v311_v28 = vrot.slane %v3453_v21, %v3426_v51 }
  0xae   :  { %v3284_v30 = vpop.eup %3283  ;;  %v3494_v31 = vmax.f32 %v157_v19, -100.0  ;;  %v221_v32 = vmul.f32 0.6931472, %v3282_v23  ;;  %v820_v34 = vrot.slane %v812_v20, %v3446_v9  ;;  %v315_v35 = vrot.slane %v3453_v21, %v3429_v53 }
  0xaf   :  { %v3499_v36 = vmax.f32 %v159_v26, -100.0  ;;  %v223_v38 = vmul.f32 0.6931472, %v3284_v30  ;;  %v827_v40 = vrot.slane %v813_v27, %v3446_v9  ;;  %v319_v41 = vrot.slane %v3453_v21, %v3432_v54 }
  0xb0   :  { %v3504_v44 = vmax.f32 %v221_v32, -100.0  ;;  %v323_v46 = vrot.slane %v3453_v21, %v3435_v60  ;;  %v327_v47 = vrot.slane %v3453_v21, %v3438_v61  ;;  %v331_v48 = vrot.slane %v3453_v21, %v3441_v5 }
  0xb1   :  { %v3512_v56 = vmax.f32 %v223_v38, -100.0  ;;  %v828_v57 = vcombine.low %v820_v34, %v827_v40  ;;  %v829_v58 = vcombine.low %v303_v15, %v307_v22  ;;  %v830_v59 = vcombine.low %v311_v28, %v315_v35 }
  0xb2   :  { %v831_v63 = vcombine.low %v319_v41, %v323_v46  ;;  %v832_v0 = vcombine.low %v327_v47, %v331_v48  ;;  %3285 = vlog2.f32 %v123_v43  ;;  %v198_v1 = vsub.f32 1.0, %v123_v43 }
  0xb3   :  { %1565 = vperm.xlu0 %3243, %v828_v57   ;;  %v839_v2 = vrot.slane %v829_v58, %v3446_v9  ;;  %v846_v6 = vrot.slane %v830_v59, %v3446_v9  ;;  %3287 = vlog2.f32 %v126_v52  ;;  %v199_v3 = vsub.f32 1.0, %v126_v52 }
  0xb4   :  { %v853_v8 = vrot.slane %v831_v63, %v3446_v9  ;;  %v860_v21 = vrot.slane %v832_v0, %v3446_v9  ;;  %3289 = vlog2.f32 %v198_v1  ;;  %v335_v10 = vrot.slane %v3443_v7, %v3420_v49 }
  0xb5   :  { %v861_v13 = vcombine.low %v839_v2, %v846_v6  ;;  %3291 = vlog2.f32 %v199_v3  ;;  %v339_v14 = vrot.slane %v3443_v7, %v3423_v50  ;;  %v343_v15 = vrot.slane %v3443_v7, %v3426_v51 }
  0xb6   :  { %v862_v16 = vcombine.low %v853_v8, %v860_v21  ;;  %v347_v19 = vrot.slane %v3443_v7, %v3429_v53  ;;  %v351_v20 = vrot.slane %v3443_v7, %v3432_v54  ;;  %v355_v22 = vrot.slane %v3443_v7, %v3435_v60 }
  0xb7   :  { %v869_v23 = vrot.slane %v861_v13, %v3446_v9  ;;  %v359_v26 = vrot.slane %v3443_v7, %v3438_v61  ;;  %v363_v27 = vrot.slane %v3443_v7, %v3441_v5  ;;  %v878_v28 = vcombine.low %v335_v10, %v339_v14 }
  0xb8   :  { %v876_v30 = vrot.slane %v862_v16, %v3446_v9  ;;  %v879_v32 = vcombine.low %v343_v15, %v347_v19  ;;  %v880_v34 = vcombine.low %v351_v20, %v355_v22  ;;  %v1887_v35 = vrot.slane %v3472_v55, %v3420_v49 }
  0xb9   :  { %v881_v38 = vcombine.low %v359_v26, %v363_v27  ;;  %v888_v40 = vrot.slane %v878_v28, %v3446_v9  ;;  %v1891_v41 = vrot.slane %v3472_v55, %v3423_v50  ;;  %v1895_v43 = vrot.slane %v3472_v55, %v3426_v51 }
  0xba   :  { %v877_v46 = vcombine.low %v869_v23, %v876_v30  ;;  %v895_v7 = vrot.slane %v879_v32, %v3446_v9  ;;  %v902_v47 = vrot.slane %v880_v34, %v3446_v9  ;;  %v1899_v48 = vrot.slane %v3472_v55, %v3429_v53 }
  0xbb   :  { %v909_v52 = vrot.slane %v881_v38, %v3446_v9  ;;  %v1903_v57 = vrot.slane %v3472_v55, %v3432_v54  ;;  %v1907_v58 = vrot.slane %v3472_v55, %v3435_v60  ;;  %v1911_v59 = vrot.slane %v3472_v55, %v3438_v61 }
  0xbc   :  { %v3286_v63 = vpop.eup %3285  ;;  %1568 = vperm.xlu1 %3244, %v877_v46   ;;  %v910_v0 = vcombine.low %v888_v40, %v895_v7  ;;  %v1915_v1 = vrot.slane %v3472_v55, %v3441_v5  ;;  %v2464_v2 = vcombine.low %v1887_v35, %v1891_v41  ;;  %v2465_v6 = vcombine.low %v1895_v43, %v1899_v48  ;;  %v129_v48 = vpop.xlane.xlu0 %128 }
  0xbd   :  { %v3288_v3 = vpop.eup %3287  ;;  %v161_v8 = vmul.f32 0.6931472, %v3286_v63  ;;  %v911_v21 = vcombine.low %v902_v47, %v909_v52  ;;  %v2466_v10 = vcombine.low %v1903_v57, %v1907_v58  ;;  %v367_v13 = vrot.slane %v3455_v25, %v3420_v49 }
  0xbe   :  { %v3290_v14 = vpop.eup %3289  ;;  %v163_v15 = vmul.f32 0.6931472, %v3288_v3  ;;  %v918_v16 = vrot.slane %v910_v0, %v3446_v9  ;;  %v2467_v19 = vcombine.low %v1911_v59, %v1915_v1  ;;  %v2474_v20 = vrot.slane %v2464_v2, %v3446_v9 }
  0xbf   :  { %v3292_v22 = vpop.eup %3291  ;;  %v3560_v23 = vmax.f32 %v161_v8, -100.0  ;;  %v225_v55 = vmul.f32 0.6931472, %v3290_v14  ;;  %v925_v26 = vrot.slane %v911_v21, %v3446_v9  ;;  %v2481_v27 = vrot.slane %v2465_v6, %v3446_v9 }
  0xc0   :  { %v3564_v28 = vmax.f32 %v163_v15, -100.0  ;;  %v227_v30 = vmul.f32 0.6931472, %v3292_v22  ;;  %v2488_v32 = vrot.slane %v2466_v10, %v3446_v9  ;;  %v2495_v34 = vrot.slane %v2467_v19, %v3446_v9 }
  0xc1   :  { %v3568_v35 = vmax.f32 %v225_v55, -100.0  ;;  %v926_v38 = vcombine.low %v918_v16, %v925_v26  ;;  %v2496_v40 = vcombine.low %v2474_v20, %v2481_v27  ;;  %v371_v41 = vrot.slane %v3455_v25, %v3423_v50  ;;  %v132_v26 = vpop.xlane.xlu1 %131 }
  0xc2   :  { %v3572_v43 = vmax.f32 %v227_v30, -100.0  ;;  %v2497_v46 = vcombine.low %v2488_v32, %v2495_v34  ;;  %v375_v7 = vrot.slane %v3455_v25, %v3426_v51  ;;  %v379_v47 = vrot.slane %v3455_v25, %v3429_v53 }
  0xc3   :  { %1571 = vperm.xlu1 %3244, %v926_v38   ;;  %v2504_v52 = vrot.slane %v2496_v40, %v3446_v9  ;;  %v383_v57 = vrot.slane %v3455_v25, %v3432_v54  ;;  %v387_v58 = vrot.slane %v3455_v25, %v3435_v60  ;;  %v391_v59 = vrot.slane %v3455_v25, %v3438_v61 }
  0xc4   :  { %v2511_v63 = vrot.slane %v2497_v46, %v3446_v9  ;;  %v395_v0 = vrot.slane %v3455_v25, %v3441_v5  ;;  %v927_v1 = vcombine.low %v367_v13, %v371_v41  ;;  %v928_v2 = vcombine.low %v375_v7, %v379_v47 }
  0xc5   :  { %v929_v6 = vcombine.low %v383_v57, %v387_v58  ;;  %3293 = vlog2.f32 %v129_v48  ;;  %v200_v3 = vsub.f32 1.0, %v129_v48  ;;  %v1919_v8 = vrot.slane %v3474_v62, %v3420_v49 }
  0xc6   :  { %v2512_v21 = vcombine.low %v2504_v52, %v2511_v63  ;;  %v930_v10 = vcombine.low %v391_v59, %v395_v0  ;;  %v937_v14 = vrot.slane %v927_v1, %v3446_v9  ;;  %v944_v15 = vrot.slane %v928_v2, %v3446_v9 }
  0xc7   :  { %v951_v16 = vrot.slane %v929_v6, %v3446_v9  ;;  %3295 = vlog2.f32 %v200_v3  ;;  %v1923_v25 = vrot.slane %v3474_v62, %v3423_v50  ;;  %v1927_v13 = vrot.slane %v3474_v62, %v3426_v51 }
  0xc8   :  { %3065 = vperm.xlu0 %3243, %v2512_v21   ;;  %v958_v19 = vrot.slane %v930_v10, %v3446_v9  ;;  %v959_v20 = vcombine.low %v937_v14, %v944_v15  ;;  %v1931_v22 = vrot.slane %v3474_v62, %v3429_v53  ;;  %v1935_v55 = vrot.slane %v3474_v62, %v3432_v54 }
  0xc9   :  { %v1939_v27 = vrot.slane %v3474_v62, %v3435_v60  ;;  %v1943_v30 = vrot.slane %v3474_v62, %v3438_v61  ;;  %v1947_v32 = vrot.slane %v3474_v62, %v3441_v5  ;;  %v2513_v34 = vcombine.low %v1919_v8, %v1923_v25 }
  0xca   :  { %v960_v38 = vcombine.low %v951_v16, %v958_v19  ;;  %v967_v40 = vrot.slane %v959_v20, %v3446_v9  ;;  %v2514_v41 = vcombine.low %v1927_v13, %v1931_v22  ;;  %3297 = vlog2.f32 %v132_v26 }
  0xcb   :  { %v2515_v46 = vcombine.low %v1935_v55, %v1939_v27  ;;  %v2516_v7 = vcombine.low %v1943_v30, %v1947_v32  ;;  %v2523_v47 = vrot.slane %v2513_v34, %v3446_v9  ;;  %v201_v48 = vsub.f32 1.0, %v132_v26 }
  0xcc   :  { %v974_v52 = vrot.slane %v960_v38, %v3446_v9  ;;  %v2530_v57 = vrot.slane %v2514_v41, %v3446_v9  ;;  %v399_v58 = vrot.slane %v3465_v39, %v3420_v49  ;;  %v403_v62 = vrot.slane %v3465_v39, %v3423_v50 }
  0xcd   :  { %v2537_v59 = vrot.slane %v2515_v46, %v3446_v9  ;;  %v2544_v63 = vrot.slane %v2516_v7, %v3446_v9  ;;  %3299 = vlog2.f32 %v201_v48  ;;  %v407_v0 = vrot.slane %v3465_v39, %v3426_v51 }
  0xce   :  { %v975_v1 = vcombine.low %v967_v40, %v974_v52  ;;  %v2545_v2 = vcombine.low %v2523_v47, %v2530_v57  ;;  %v411_v6 = vrot.slane %v3465_v39, %v3429_v53  ;;  %v415_v3 = vrot.slane %v3465_v39, %v3432_v54 }
  0xcf   :  { %v3294_v8 = vpop.eup %3293  ;;  %v2546_v21 = vcombine.low %v2537_v59, %v2544_v63  ;;  %v419_v10 = vrot.slane %v3465_v39, %v3435_v60  ;;  %v423_v14 = vrot.slane %v3465_v39, %v3438_v61  ;;  %v427_v15 = vrot.slane %v3465_v39, %v3441_v5 }
  0xd0   :  { %1574 = vperm.xlu1 %3244, %v975_v1   ;;  %v165_v16 = vmul.f32 0.6931472, %v3294_v8  ;;  %v2553_v25 = vrot.slane %v2545_v2, %v3446_v9  ;;  %v976_v13 = vcombine.low %v399_v58, %v403_v62  ;;  %v977_v19 = vcombine.low %v407_v0, %v411_v6 }
  0xd1   :  { %v3296_v20 = vpop.eup %3295  ;;  %v2560_v22 = vrot.slane %v2546_v21, %v3446_v9  ;;  %v978_v55 = vcombine.low %v415_v3, %v419_v10  ;;  %v979_v26 = vcombine.low %v423_v14, %v427_v15  ;;  %v1951_v27 = vrot.slane %v3486_v18, %v3420_v49 }
  0xd2   :  { %v3634_v30 = vmax.f32 %v165_v16, -100.0  ;;  %v229_v32 = vmul.f32 0.6931472, %v3296_v20  ;;  %v986_v34 = vrot.slane %v976_v13, %v3446_v9  ;;  %v993_v39 = vrot.slane %v977_v19, %v3446_v9 }
  0xd3   :  { %v2561_v38 = vcombine.low %v2553_v25, %v2560_v22  ;;  %v1000_v40 = vrot.slane %v978_v55, %v3446_v9  ;;  %v1007_v41 = vrot.slane %v979_v26, %v3446_v9  ;;  %v1955_v46 = vrot.slane %v3486_v18, %v3423_v50 }
  0xd4   :  { %v3298_v7 = vpop.eup %3297  ;;  %v3642_v47 = vmax.f32 %v229_v32, -100.0  ;;  %v1008_v48 = vcombine.low %v986_v34, %v993_v39  ;;  %v1959_v52 = vrot.slane %v3486_v18, %v3426_v51  ;;  %v1963_v57 = vrot.slane %v3486_v18, %v3429_v53  ;;  %v135_v34 = vpop.xlane.xlu0 %134 }
  0xd5   :  { %3068 = vperm.xlu0 %3243, %v2561_v38   ;;  %v167_v58 = vmul.f32 0.6931472, %v3298_v7  ;;  %v1009_v62 = vcombine.low %v1000_v40, %v1007_v41  ;;  %v1967_v59 = vrot.slane %v3486_v18, %v3432_v54  ;;  %v1971_v63 = vrot.slane %v3486_v18, %v3435_v60 }
  0xd6   :  { %v1016_v0 = vrot.slane %v1008_v48, %v3446_v9  ;;  %v1975_v1 = vrot.slane %v3486_v18, %v3438_v61  ;;  %v1979_v2 = vrot.slane %v3486_v18, %v3441_v5  ;;  %v2562_v6 = vcombine.low %v1951_v27, %v1955_v46 }
  0xd7   :  { %v3300_v3 = vpop.eup %3299  ;;  %v3657_v8 = vmax.f32 %v167_v58, -100.0  ;;  %v1023_v21 = vrot.slane %v1009_v62, %v3446_v9  ;;  %v2563_v10 = vcombine.low %v1959_v52, %v1963_v57  ;;  %v2564_v14 = vcombine.low %v1967_v59, %v1971_v63 }
  0xd8   :  { %v231_v15 = vmul.f32 0.6931472, %v3300_v3  ;;  %v2565_v16 = vcombine.low %v1975_v1, %v1979_v2  ;;  %v2572_v25 = vrot.slane %v2562_v6, %v3446_v9  ;;  %v431_v13 = vrot.slane %v3469_v45, %v3420_v49 }
  0xd9   :  { %v1024_v19 = vcombine.low %v1016_v0, %v1023_v21  ;;  %v2579_v20 = vrot.slane %v2563_v10, %v3446_v9  ;;  %v2586_v18 = vrot.slane %v2564_v14, %v3446_v9  ;;  %v435_v22 = vrot.slane %v3469_v45, %v3423_v50 }
  0xda   :  { %v3667_v55 = vmax.f32 %v231_v15, -100.0  ;;  %v2593_v26 = vrot.slane %v2565_v16, %v3446_v9  ;;  %v439_v27 = vrot.slane %v3469_v45, %v3426_v51  ;;  %v443_v32 = vrot.slane %v3469_v45, %v3429_v53  ;;  %v138_v15 = vpop.xlane.xlu1 %137 }
  0xdb   :  { %1577 = vperm.xlu1 %3244, %v1024_v19   ;;  %v2594_v39 = vcombine.low %v2572_v25, %v2579_v20  ;;  %v447_v38 = vrot.slane %v3469_v45, %v3432_v54  ;;  %v451_v40 = vrot.slane %v3469_v45, %v3435_v60  ;;  %v455_v41 = vrot.slane %v3469_v45, %v3438_v61 }
  0xdc   :  { %v2595_v46 = vcombine.low %v2586_v18, %v2593_v26  ;;  %v459_v7 = vrot.slane %v3469_v45, %v3441_v5  ;;  %v1025_v48 = vcombine.low %v431_v13, %v435_v22  ;;  %v1026_v52 = vcombine.low %v439_v27, %v443_v32 }
  0xdd   :  { %v2602_v57 = vrot.slane %v2594_v39, %v3446_v9  ;;  %v1027_v58 = vcombine.low %v447_v38, %v451_v40  ;;  %3301 = vlog2.f32 %v135_v34  ;;  %v202_v62 = vsub.f32 1.0, %v135_v34 }
  0xde   :  { %v2609_v59 = vrot.slane %v2595_v46, %v3446_v9  ;;  %v1028_v63 = vcombine.low %v455_v41, %v459_v7  ;;  %v1035_v0 = vrot.slane %v1025_v48, %v3446_v9  ;;  %v1042_v1 = vrot.slane %v1026_v52, %v3446_v9 }
  0xdf   :  { %v1049_v2 = vrot.slane %v1027_v58, %v3446_v9  ;;  %3303 = vlog2.f32 %v202_v62  ;;  %v1983_v45 = vrot.slane %v3490_v24, %v3420_v49  ;;  %v1987_v6 = vrot.slane %v3490_v24, %v3423_v50 }
  0xe0   :  { %v2610_v3 = vcombine.low %v2602_v57, %v2609_v59  ;;  %v1056_v21 = vrot.slane %v1028_v63, %v3446_v9  ;;  %v1057_v10 = vcombine.low %v1035_v0, %v1042_v1  ;;  %v1991_v14 = vrot.slane %v3490_v24, %v3426_v51 }
  0xe1   :  { %v1995_v16 = vrot.slane %v3490_v24, %v3429_v53  ;;  %v1999_v25 = vrot.slane %v3490_v24, %v3432_v54  ;;  %v2003_v13 = vrot.slane %v3490_v24, %v3435_v60  ;;  %v2007_v19 = vrot.slane %v3490_v24, %v3438_v61 }
  0xe2   :  { %3071 = vperm.xlu0 %3243, %v2610_v3   ;;  %v1058_v20 = vcombine.low %v1049_v2, %v1056_v21  ;;  %v1065_v18 = vrot.slane %v1057_v10, %v3446_v9  ;;  %v2011_v22 = vrot.slane %v3490_v24, %v3441_v5  ;;  %v2611_v26 = vcombine.low %v1983_v45, %v1987_v6 }
  0xe3   :  { %v2612_v27 = vcombine.low %v1991_v14, %v1995_v16  ;;  %v2613_v32 = vcombine.low %v1999_v25, %v2003_v13  ;;  %3305 = vlog2.f32 %v138_v15  ;;  %v203_v34 = vsub.f32 1.0, %v138_v15 }
  0xe4   :  { %v1072_v39 = vrot.slane %v1058_v20, %v3446_v9  ;;  %v2614_v38 = vcombine.low %v2007_v19, %v2011_v22  ;;  %v2621_v40 = vrot.slane %v2611_v26, %v3446_v9  ;;  %v463_v41 = vrot.slane %v3477_v4, %v3420_v49 }
  0xe5   :  { %v2628_v46 = vrot.slane %v2612_v27, %v3446_v9  ;;  %v2635_v7 = vrot.slane %v2613_v32, %v3446_v9  ;;  %3307 = vlog2.f32 %v203_v34  ;;  %v467_v24 = vrot.slane %v3477_v4, %v3423_v50 }
  0xe6   :  { %v1073_v48 = vcombine.low %v1065_v18, %v1072_v39  ;;  %v2642_v52 = vrot.slane %v2614_v38, %v3446_v9  ;;  %v471_v57 = vrot.slane %v3477_v4, %v3426_v51  ;;  %v475_v58 = vrot.slane %v3477_v4, %v3429_v53 }
  0xe7   :  { %v3302_v62 = vpop.eup %3301  ;;  %v2643_v59 = vcombine.low %v2621_v40, %v2628_v46  ;;  %v479_v63 = vrot.slane %v3477_v4, %v3432_v54  ;;  %v483_v0 = vrot.slane %v3477_v4, %v3435_v60  ;;  %v487_v1 = vrot.slane %v3477_v4, %v3438_v61 }
  0xe8   :  { %1580 = vperm.xlu1 %3244, %v1073_v48   ;;  %v169_v2 = vmul.f32 0.6931472, %v3302_v62  ;;  %v2644_v45 = vcombine.low %v2635_v7, %v2642_v52  ;;  %v491_v6 = vrot.slane %v3477_v4, %v3441_v5  ;;  %v1074_v3 = vcombine.low %v463_v41, %v467_v24 }
  0xe9   :  { %v3304_v21 = vpop.eup %3303  ;;  %v2651_v10 = vrot.slane %v2643_v59, %v3446_v9  ;;  %v1075_v14 = vcombine.low %v471_v57, %v475_v58  ;;  %v1076_v15 = vcombine.low %v479_v63, %v483_v0  ;;  %v2015_v16 = vrot.slane %v3504_v44, %v3420_v49 }
  0xea   :  { %v3729_v25 = vmax.f32 %v169_v2, -100.0  ;;  %v233_v13 = vmul.f32 0.6931472, %v3304_v21  ;;  %v2658_v19 = vrot.slane %v2644_v45, %v3446_v9  ;;  %v1077_v20 = vcombine.low %v487_v1, %v491_v6 }
  0xeb   :  { %v1084_v18 = vrot.slane %v1074_v3, %v3446_v9  ;;  %v1091_v22 = vrot.slane %v1075_v14, %v3446_v9  ;;  %v1098_v4 = vrot.slane %v1076_v15, %v3446_v9  ;;  %v2019_v26 = vrot.slane %v3504_v44, %v3423_v50 }
  0xec   :  { %v3737_v27 = vmax.f32 %v233_v13, -100.0  ;;  %v2659_v32 = vcombine.low %v2651_v10, %v2658_v19  ;;  %v1105_v34 = vrot.slane %v1077_v20, %v3446_v9  ;;  %v2023_v39 = vrot.slane %v3504_v44, %v3426_v51 }
  0xed   :  { %v3306_v38 = vpop.eup %3305  ;;  %v1106_v40 = vcombine.low %v1084_v18, %v1091_v22  ;;  %v2027_v41 = vrot.slane %v3504_v44, %v3429_v53  ;;  %v2031_v46 = vrot.slane %v3504_v44, %v3432_v54  ;;  %v2035_v7 = vrot.slane %v3504_v44, %v3435_v60 }
  0xee   :  { %3074 = vperm.xlu0 %3243, %v2659_v32   ;;  %v171_v24 = vmul.f32 0.6931472, %v3306_v38  ;;  %v1107_v48 = vcombine.low %v1098_v4, %v1105_v34  ;;  %v2039_v52 = vrot.slane %v3504_v44, %v3438_v61  ;;  %v2043_v57 = vrot.slane %v3504_v44, %v3441_v5 }
  0xef   :  { %v3308_v58 = vpop.eup %3307  ;;  %v1114_v62 = vrot.slane %v1106_v40, %v3446_v9  ;;  %v2660_v59 = vcombine.low %v2015_v16, %v2019_v26  ;;  %v2661_v63 = vcombine.low %v2023_v39, %v2027_v41  ;;  %v2662_v0 = vcombine.low %v2031_v46, %v2035_v7 }
  0xf0   :  { %v3753_v1 = vmax.f32 %v171_v24, -100.0  ;;  %v235_v2 = vmul.f32 0.6931472, %v3308_v58  ;;  %v1121_v45 = vrot.slane %v1107_v48, %v3446_v9  ;;  %v2663_v6 = vcombine.low %v2039_v52, %v2043_v57 }
  0xf1   :  { %v2670_v3 = vrot.slane %v2660_v59, %v3446_v9  ;;  %v2677_v21 = vrot.slane %v2661_v63, %v3446_v9  ;;  %v2684_v10 = vrot.slane %v2662_v0, %v3446_v9  ;;  %v495_v44 = vrot.slane %v3481_v12, %v3420_v49 }
  0xf2   :  { %v3761_v14 = vmax.f32 %v235_v2, -100.0  ;;  %v1122_v15 = vcombine.low %v1114_v62, %v1121_v45  ;;  %v2691_v16 = vrot.slane %v2663_v6, %v3446_v9  ;;  %v499_v13 = vrot.slane %v3481_v12, %v3423_v50 }
  0xf3   :  { %v2692_v19 = vcombine.low %v2670_v3, %v2677_v21  ;;  %v503_v20 = vrot.slane %v3481_v12, %v3426_v51  ;;  %v507_v18 = vrot.slane %v3481_v12, %v3429_v53  ;;  %v511_v22 = vrot.slane %v3481_v12, %v3432_v54 }
  0xf4   :  { %1583 = vperm.xlu1 %3244, %v1122_v15   ;;  %v2693_v4 = vcombine.low %v2684_v10, %v2691_v16  ;;  %v515_v26 = vrot.slane %v3481_v12, %v3435_v60  ;;  %v519_v32 = vrot.slane %v3481_v12, %v3438_v61  ;;  %v523_v34 = vrot.slane %v3481_v12, %v3441_v5 }
  0xf5   :  { %v2700_v39 = vrot.slane %v2692_v19, %v3446_v9  ;;  %v1123_v38 = vcombine.low %v495_v44, %v499_v13  ;;  %v1124_v40 = vcombine.low %v503_v20, %v507_v18  ;;  %v2047_v41 = vrot.slane %v3512_v56, %v3420_v49 }
  0xf6   :  { %v2707_v46 = vrot.slane %v2693_v4, %v3446_v9  ;;  %v1125_v7 = vcombine.low %v511_v22, %v515_v26  ;;  %v1126_v24 = vcombine.low %v519_v32, %v523_v34  ;;  %v2051_v48 = vrot.slane %v3512_v56, %v3423_v50 }
  0xf7   :  { %v1133_v52 = vrot.slane %v1123_v38, %v3446_v9  ;;  %v1140_v57 = vrot.slane %v1124_v40, %v3446_v9  ;;  %v2055_v12 = vrot.slane %v3512_v56, %v3426_v51  ;;  %v2059_v58 = vrot.slane %v3512_v56, %v3429_v53 }
  0xf8   :  { %v2708_v62 = vcombine.low %v2700_v39, %v2707_v46  ;;  %v1147_v59 = vrot.slane %v1125_v7, %v3446_v9  ;;  %v1154_v63 = vrot.slane %v1126_v24, %v3446_v9  ;;  %v2063_v0 = vrot.slane %v3512_v56, %v3432_v54 }
  0xf9   :  { %v1155_v2 = vcombine.low %v1133_v52, %v1140_v57  ;;  %v2067_v45 = vrot.slane %v3512_v56, %v3435_v60  ;;  %v2071_v6 = vrot.slane %v3512_v56, %v3438_v61  ;;  %v2075_v3 = vrot.slane %v3512_v56, %v3441_v5 }
  0xfa   :  { %3077 = vperm.xlu0 %3243, %v2708_v62   ;;  %v1156_v21 = vcombine.low %v1147_v59, %v1154_v63  ;;  %v2709_v10 = vcombine.low %v2047_v41, %v2051_v48  ;;  %v2710_v44 = vcombine.low %v2055_v12, %v2059_v58  ;;  %v527_v15 = vrot.slane %v3494_v31, %v3420_v49 }
  0xfb   :  { %v1163_v16 = vrot.slane %v1155_v2, %v3446_v9  ;;  %v2711_v13 = vcombine.low %v2063_v0, %v2067_v45  ;;  %v2712_v19 = vcombine.low %v2071_v6, %v2075_v3  ;;  %v531_v20 = vrot.slane %v3494_v31, %v3423_v50 }
  0xfc   :  { %v1170_v18 = vrot.slane %v1156_v21, %v3446_v9  ;;  %v2719_v22 = vrot.slane %v2709_v10, %v3446_v9  ;;  %v2726_v56 = vrot.slane %v2710_v44, %v3446_v9  ;;  %v535_v4 = vrot.slane %v3494_v31, %v3426_v51 }
  0xfd   :  { %v2733_v26 = vrot.slane %v2711_v13, %v3446_v9  ;;  %v2740_v32 = vrot.slane %v2712_v19, %v3446_v9  ;;  %v539_v34 = vrot.slane %v3494_v31, %v3429_v53  ;;  %v543_v39 = vrot.slane %v3494_v31, %v3432_v54 }
  0xfe   :  { %v1171_v38 = vcombine.low %v1163_v16, %v1170_v18  ;;  %v2741_v40 = vcombine.low %v2719_v22, %v2726_v56  ;;  %v547_v41 = vrot.slane %v3494_v31, %v3435_v60  ;;  %v551_v46 = vrot.slane %v3494_v31, %v3438_v61 }
  0xff   :  { %v2742_v7 = vcombine.low %v2733_v26, %v2740_v32  ;;  %v555_v24 = vrot.slane %v3494_v31, %v3441_v5  ;;  %v1172_v48 = vcombine.low %v527_v15, %v531_v20  ;;  %v1173_v52 = vcombine.low %v535_v4, %v539_v34 }
 0x100   :  { %1586 = vperm.xlu1 %3244, %v1171_v38   ;;  %v2749_v57 = vrot.slane %v2741_v40, %v3446_v9  ;;  %v1174_v12 = vcombine.low %v543_v39, %v547_v41  ;;  %v2079_v58 = vrot.slane %v3568_v35, %v3420_v49  ;;  %v2083_v62 = vrot.slane %v3568_v35, %v3423_v50 }
 0x101   :  { %v2756_v59 = vrot.slane %v2742_v7, %v3446_v9  ;;  %v1175_v63 = vcombine.low %v551_v46, %v555_v24  ;;  %v1182_v0 = vrot.slane %v1172_v48, %v3446_v9  ;;  %v1189_v2 = vrot.slane %v1173_v52, %v3446_v9 }
 0x102   :  { %v1196_v31 = vrot.slane %v1174_v12, %v3446_v9  ;;  %v2087_v45 = vrot.slane %v3568_v35, %v3426_v51  ;;  %v2091_v6 = vrot.slane %v3568_v35, %v3429_v53  ;;  %v2095_v3 = vrot.slane %v3568_v35, %v3432_v54 }
 0x103   :  { %v2757_v21 = vcombine.low %v2749_v57, %v2756_v59  ;;  %v1203_v10 = vrot.slane %v1175_v63, %v3446_v9  ;;  %v1204_v44 = vcombine.low %v1182_v0, %v1189_v2  ;;  %v2099_v15 = vrot.slane %v3568_v35, %v3435_v60 }
 0x104   :  { %v2103_v16 = vrot.slane %v3568_v35, %v3438_v61  ;;  %v2107_v13 = vrot.slane %v3568_v35, %v3441_v5  ;;  %v2758_v19 = vcombine.low %v2079_v58, %v2083_v62  ;;  %v2759_v20 = vcombine.low %v2087_v45, %v2091_v6 }
 0x105   :  { %3080 = vperm.xlu0 %3243, %v2757_v21   ;;  %v1205_v18 = vcombine.low %v1196_v31, %v1203_v10  ;;  %v1212_v22 = vrot.slane %v1204_v44, %v3446_v9  ;;  %v2760_v56 = vcombine.low %v2095_v3, %v2099_v15  ;;  %v559_v4 = vrot.slane %v3499_v36, %v3420_v49 }
 0x106   :  { %v2761_v26 = vcombine.low %v2103_v16, %v2107_v13  ;;  %v2768_v32 = vrot.slane %v2758_v19, %v3446_v9  ;;  %v2775_v34 = vrot.slane %v2759_v20, %v3446_v9  ;;  %v563_v39 = vrot.slane %v3499_v36, %v3423_v50 }
 0x107   :  { %v1219_v35 = vrot.slane %v1205_v18, %v3446_v9  ;;  %v2782_v38 = vrot.slane %v2760_v56, %v3446_v9  ;;  %v567_v40 = vrot.slane %v3499_v36, %v3426_v51  ;;  %v571_v41 = vrot.slane %v3499_v36, %v3429_v53 }
 0x108   :  { %v2789_v46 = vrot.slane %v2761_v26, %v3446_v9  ;;  %v2790_v7 = vcombine.low %v2768_v32, %v2775_v34  ;;  %v575_v24 = vrot.slane %v3499_v36, %v3432_v54  ;;  %v579_v48 = vrot.slane %v3499_v36, %v3435_v60 }
 0x109   :  { %v1220_v52 = vcombine.low %v1212_v22, %v1219_v35  ;;  %v583_v57 = vrot.slane %v3499_v36, %v3438_v61  ;;  %v587_v12 = vrot.slane %v3499_v36, %v3441_v5  ;;  %v1221_v58 = vcombine.low %v559_v4, %v563_v39 }
 0x10a   :  { %v2791_v62 = vcombine.low %v2782_v38, %v2789_v46  ;;  %v2798_v59 = vrot.slane %v2790_v7, %v3446_v9  ;;  %v1222_v63 = vcombine.low %v567_v40, %v571_v41  ;;  %v1223_v0 = vcombine.low %v575_v24, %v579_v48 }
 0x10b   :  { %1589 = vperm.xlu1 %3244, %v1220_v52   ;;  %v1224_v2 = vcombine.low %v583_v57, %v587_v12  ;;  %v1231_v31 = vrot.slane %v1221_v58, %v3446_v9  ;;  %v2111_v45 = vrot.slane %v3572_v43, %v3420_v49  ;;  %v2115_v6 = vrot.slane %v3572_v43, %v3423_v50 }
 0x10c   :  { %v2805_v3 = vrot.slane %v2791_v62, %v3446_v9  ;;  %v1238_v36 = vrot.slane %v1222_v63, %v3446_v9  ;;  %v1245_v21 = vrot.slane %v1223_v0, %v3446_v9  ;;  %v2119_v10 = vrot.slane %v3572_v43, %v3426_v51 }
 0x10d   :  { %v1252_v44 = vrot.slane %v1224_v2, %v3446_v9  ;;  %v2123_v15 = vrot.slane %v3572_v43, %v3429_v53  ;;  %v2127_v16 = vrot.slane %v3572_v43, %v3432_v54  ;;  %v2131_v13 = vrot.slane %v3572_v43, %v3435_v60 }
 0x10e   :  { %v2806_v19 = vcombine.low %v2798_v59, %v2805_v3  ;;  %v1253_v20 = vcombine.low %v1231_v31, %v1238_v36  ;;  %v2135_v18 = vrot.slane %v3572_v43, %v3438_v61  ;;  %v2139_v22 = vrot.slane %v3572_v43, %v3441_v5 }
 0x10f   :  { %v1254_v56 = vcombine.low %v1245_v21, %v1252_v44  ;;  %v2807_v4 = vcombine.low %v2111_v45, %v2115_v6  ;;  %v2808_v26 = vcombine.low %v2119_v10, %v2123_v15  ;;  %v2809_v32 = vcombine.low %v2127_v16, %v2131_v13 }
 0x110   :  { %3083 = vperm.xlu0 %3243, %v2806_v19   ;;  %v1261_v34 = vrot.slane %v1253_v20, %v3446_v9  ;;  %v2810_v39 = vcombine.low %v2135_v18, %v2139_v22  ;;  %v591_v35 = vrot.slane %v3560_v23, %v3420_v49  ;;  %v595_v38 = vrot.slane %v3560_v23, %v3423_v50 }
 0x111   :  { %v1268_v40 = vrot.slane %v1254_v56, %v3446_v9  ;;  %v2817_v41 = vrot.slane %v2807_v4, %v3446_v9  ;;  %v2824_v43 = vrot.slane %v2808_v26, %v3446_v9  ;;  %v2831_v46 = vrot.slane %v2809_v32, %v3446_v9 }
 0x112   :  { %v2838_v7 = vrot.slane %v2810_v39, %v3446_v9  ;;  %v599_v24 = vrot.slane %v3560_v23, %v3426_v51  ;;  %v603_v48 = vrot.slane %v3560_v23, %v3429_v53  ;;  %v607_v52 = vrot.slane %v3560_v23, %v3432_v54 }
 0x113   :  { %v1269_v57 = vcombine.low %v1261_v34, %v1268_v40  ;;  %v2839_v12 = vcombine.low %v2817_v41, %v2824_v43  ;;  %v611_v58 = vrot.slane %v3560_v23, %v3435_v60  ;;  %v615_v62 = vrot.slane %v3560_v23, %v3438_v61 }
 0x114   :  { %v2840_v59 = vcombine.low %v2831_v46, %v2838_v7  ;;  %v619_v63 = vrot.slane %v3560_v23, %v3441_v5  ;;  %v1270_v0 = vcombine.low %v591_v35, %v595_v38  ;;  %v1271_v2 = vcombine.low %v599_v24, %v603_v48 }
 0x115   :  { %1592 = vperm.xlu1 %3244, %v1269_v57   ;;  %v2847_v31 = vrot.slane %v2839_v12, %v3446_v9  ;;  %v1272_v45 = vcombine.low %v607_v52, %v611_v58  ;;  %v2143_v6 = vrot.slane %v3642_v47, %v3420_v49  ;;  %v2147_v3 = vrot.slane %v3642_v47, %v3423_v50 }
 0x116   :  { %v2854_v36 = vrot.slane %v2840_v59, %v3446_v9  ;;  %v1273_v21 = vcombine.low %v615_v62, %v619_v63  ;;  %v1280_v10 = vrot.slane %v1270_v0, %v3446_v9  ;;  %v1287_v44 = vrot.slane %v1271_v2, %v3446_v9 }
 0x117   :  { %v1294_v23 = vrot.slane %v1272_v45, %v3446_v9  ;;  %v2151_v15 = vrot.slane %v3642_v47, %v3426_v51  ;;  %v2155_v16 = vrot.slane %v3642_v47, %v3429_v53  ;;  %v2159_v13 = vrot.slane %v3642_v47, %v3432_v54 }
 0x118   :  { %v2855_v19 = vcombine.low %v2847_v31, %v2854_v36  ;;  %v1301_v20 = vrot.slane %v1273_v21, %v3446_v9  ;;  %v1302_v18 = vcombine.low %v1280_v10, %v1287_v44  ;;  %v2163_v22 = vrot.slane %v3642_v47, %v3435_v60 }
 0x119   :  { %v2167_v56 = vrot.slane %v3642_v47, %v3438_v61  ;;  %v2171_v4 = vrot.slane %v3642_v47, %v3441_v5  ;;  %v2856_v26 = vcombine.low %v2143_v6, %v2147_v3  ;;  %v2857_v32 = vcombine.low %v2151_v15, %v2155_v16 }
 0x11a   :  { %3086 = vperm.xlu0 %3243, %v2855_v19   ;;  %v1303_v34 = vcombine.low %v1294_v23, %v1301_v20  ;;  %v1310_v39 = vrot.slane %v1302_v18, %v3446_v9  ;;  %v2858_v35 = vcombine.low %v2159_v13, %v2163_v22  ;;  %v623_v38 = vrot.slane %v3564_v28, %v3420_v49 }
 0x11b   :  { %v2859_v40 = vcombine.low %v2167_v56, %v2171_v4  ;;  %v2866_v41 = vrot.slane %v2856_v26, %v3446_v9  ;;  %v2873_v43 = vrot.slane %v2857_v32, %v3446_v9  ;;  %v627_v46 = vrot.slane %v3564_v28, %v3423_v50 }
 0x11c   :  { %v1317_v47 = vrot.slane %v1303_v34, %v3446_v9  ;;  %v2880_v7 = vrot.slane %v2858_v35, %v3446_v9  ;;  %v631_v24 = vrot.slane %v3564_v28, %v3426_v51  ;;  %v635_v48 = vrot.slane %v3564_v28, %v3429_v53 }
 0x11d   :  { %v2887_v52 = vrot.slane %v2859_v40, %v3446_v9  ;;  %v2888_v57 = vcombine.low %v2866_v41, %v2873_v43  ;;  %v639_v12 = vrot.slane %v3564_v28, %v3432_v54  ;;  %v643_v58 = vrot.slane %v3564_v28, %v3435_v60 }
 0x11e   :  { %v1318_v62 = vcombine.low %v1310_v39, %v1317_v47  ;;  %v647_v59 = vrot.slane %v3564_v28, %v3438_v61  ;;  %v651_v63 = vrot.slane %v3564_v28, %v3441_v5  ;;  %v1319_v0 = vcombine.low %v623_v38, %v627_v46 }
 0x11f   :  { %v2889_v2 = vcombine.low %v2880_v7, %v2887_v52  ;;  %v2896_v31 = vrot.slane %v2888_v57, %v3446_v9  ;;  %v1320_v45 = vcombine.low %v631_v24, %v635_v48  ;;  %v1321_v6 = vcombine.low %v639_v12, %v643_v58 }
 0x120   :  { %1595 = vperm.xlu1 %3244, %v1318_v62   ;;  %v1322_v3 = vcombine.low %v647_v59, %v651_v63  ;;  %v1329_v36 = vrot.slane %v1319_v0, %v3446_v9  ;;  %v2175_v21 = vrot.slane %v3667_v55, %v3420_v49  ;;  %v2179_v10 = vrot.slane %v3667_v55, %v3423_v50 }
 0x121   :  { %v2903_v44 = vrot.slane %v2889_v2, %v3446_v9  ;;  %v1336_v28 = vrot.slane %v1320_v45, %v3446_v9  ;;  %v1343_v23 = vrot.slane %v1321_v6, %v3446_v9  ;;  %v2183_v15 = vrot.slane %v3667_v55, %v3426_v51 }
 0x122   :  { %v1350_v16 = vrot.slane %v1322_v3, %v3446_v9  ;;  %v2187_v13 = vrot.slane %v3667_v55, %v3429_v53  ;;  %v2191_v19 = vrot.slane %v3667_v55, %v3432_v54  ;;  %v2195_v20 = vrot.slane %v3667_v55, %v3435_v60 }
 0x123   :  { %v2904_v18 = vcombine.low %v2896_v31, %v2903_v44  ;;  %v1351_v22 = vcombine.low %v1329_v36, %v1336_v28  ;;  %v2199_v56 = vrot.slane %v3667_v55, %v3438_v61  ;;  %v2203_v4 = vrot.slane %v3667_v55, %v3441_v5 }
 0x124   :  { %v1352_v26 = vcombine.low %v1343_v23, %v1350_v16  ;;  %v2905_v32 = vcombine.low %v2175_v21, %v2179_v10  ;;  %v2906_v34 = vcombine.low %v2183_v15, %v2187_v13  ;;  %v2907_v39 = vcombine.low %v2191_v19, %v2195_v20 }
 0x125   :  { %3089 = vperm.xlu0 %3243, %v2904_v18   ;;  %v1359_v35 = vrot.slane %v1351_v22, %v3446_v9  ;;  %v2908_v38 = vcombine.low %v2199_v56, %v2203_v4  ;;  %v655_v40 = vrot.slane %v3634_v30, %v3420_v49  ;;  %v659_v41 = vrot.slane %v3634_v30, %v3423_v50 }
 0x126   :  { %v1366_v43 = vrot.slane %v1352_v26, %v3446_v9  ;;  %v2915_v46 = vrot.slane %v2905_v32, %v3446_v9  ;;  %v2922_v55 = vrot.slane %v2906_v34, %v3446_v9  ;;  %v2929_v47 = vrot.slane %v2907_v39, %v3446_v9 }
 0x127   :  { %v2936_v7 = vrot.slane %v2908_v38, %v3446_v9  ;;  %v663_v24 = vrot.slane %v3634_v30, %v3426_v51  ;;  %v667_v48 = vrot.slane %v3634_v30, %v3429_v53  ;;  %v671_v52 = vrot.slane %v3634_v30, %v3432_v54 }
 0x128   :  { %v1367_v57 = vcombine.low %v1359_v35, %v1366_v43  ;;  %v2937_v12 = vcombine.low %v2915_v46, %v2922_v55  ;;  %v675_v58 = vrot.slane %v3634_v30, %v3435_v60  ;;  %v679_v62 = vrot.slane %v3634_v30, %v3438_v61 }
 0x129   :  { %v2938_v59 = vcombine.low %v2929_v47, %v2936_v7  ;;  %v683_v63 = vrot.slane %v3634_v30, %v3441_v5  ;;  %v1368_v0 = vcombine.low %v655_v40, %v659_v41  ;;  %v1369_v2 = vcombine.low %v663_v24, %v667_v48 }
 0x12a   :  { %1598 = vperm.xlu1 %3244, %v1367_v57   ;;  %v2945_v31 = vrot.slane %v2937_v12, %v3446_v9  ;;  %v1370_v45 = vcombine.low %v671_v52, %v675_v58  ;;  %v2207_v6 = vrot.slane %v3737_v27, %v3420_v49  ;;  %v2211_v3 = vrot.slane %v3737_v27, %v3423_v50 }
 0x12b   :  { %v2952_v36 = vrot.slane %v2938_v59, %v3446_v9  ;;  %v1371_v21 = vcombine.low %v679_v62, %v683_v63  ;;  %v1378_v10 = vrot.slane %v1368_v0, %v3446_v9  ;;  %v1385_v44 = vrot.slane %v1369_v2, %v3446_v9 }
 0x12c   :  { %v1392_v30 = vrot.slane %v1370_v45, %v3446_v9  ;;  %v2215_v28 = vrot.slane %v3737_v27, %v3426_v51  ;;  %v2219_v23 = vrot.slane %v3737_v27, %v3429_v53  ;;  %v2223_v15 = vrot.slane %v3737_v27, %v3432_v54 }
 0x12d   :  { %v2953_v16 = vcombine.low %v2945_v31, %v2952_v36  ;;  %v1399_v13 = vrot.slane %v1371_v21, %v3446_v9  ;;  %v1400_v19 = vcombine.low %v1378_v10, %v1385_v44  ;;  %v2227_v20 = vrot.slane %v3737_v27, %v3435_v60 }
 0x12e   :  { %v2231_v18 = vrot.slane %v3737_v27, %v3438_v61  ;;  %v2235_v22 = vrot.slane %v3737_v27, %v3441_v5  ;;  %v2954_v56 = vcombine.low %v2207_v6, %v2211_v3  ;;  %v2955_v4 = vcombine.low %v2215_v28, %v2219_v23 }
 0x12f   :  { %3092 = vperm.xlu0 %3243, %v2953_v16   ;;  %v1401_v26 = vcombine.low %v1392_v30, %v1399_v13  ;;  %v1408_v32 = vrot.slane %v1400_v19, %v3446_v9  ;;  %v2956_v34 = vcombine.low %v2223_v15, %v2227_v20  ;;  %v1759_v39 = vrot.slane %v3448_v11, %v3420_v49 }
 0x130   :  { %v2957_v35 = vcombine.low %v2231_v18, %v2235_v22  ;;  %v2964_v38 = vrot.slane %v2954_v56, %v3446_v9  ;;  %v2971_v40 = vrot.slane %v2955_v4, %v3446_v9  ;;  %v1763_v41 = vrot.slane %v3448_v11, %v3423_v50 }
 0x131   :  { %v1415_v27 = vrot.slane %v1401_v26, %v3446_v9  ;;  %v2978_v43 = vrot.slane %v2956_v34, %v3446_v9  ;;  %v1767_v46 = vrot.slane %v3448_v11, %v3426_v51  ;;  %v1771_v55 = vrot.slane %v3448_v11, %v3429_v53 }
 0x132   :  { %v2985_v47 = vrot.slane %v2957_v35, %v3446_v9  ;;  %v2986_v7 = vcombine.low %v2964_v38, %v2971_v40  ;;  %v1775_v24 = vrot.slane %v3448_v11, %v3432_v54  ;;  %v1779_v48 = vrot.slane %v3448_v11, %v3435_v60 }
 0x133   :  { %v1416_v52 = vcombine.low %v1408_v32, %v1415_v27  ;;  %v1783_v57 = vrot.slane %v3448_v11, %v3438_v61  ;;  %v1787_v12 = vrot.slane %v3448_v11, %v3441_v5  ;;  %v2268_v58 = vcombine.low %v1759_v39, %v1763_v41 }
 0x134   :  { %v2987_v62 = vcombine.low %v2978_v43, %v2985_v47  ;;  %v2994_v59 = vrot.slane %v2986_v7, %v3446_v9  ;;  %v2269_v63 = vcombine.low %v1767_v46, %v1771_v55  ;;  %v2270_v0 = vcombine.low %v1775_v24, %v1779_v48 }
 0x135   :  { %1601 = vperm.xlu1 %3244, %v1416_v52   ;;  %v2271_v2 = vcombine.low %v1783_v57, %v1787_v12  ;;  %v2278_v31 = vrot.slane %v2268_v58, %v3446_v9  ;;  %v2239_v45 = vrot.slane %v3761_v14, %v3420_v49  ;;  %v2243_v6 = vrot.slane %v3761_v14, %v3423_v50 }
 0x136   :  { %v3001_v3 = vrot.slane %v2987_v62, %v3446_v9  ;;  %v2285_v11 = vrot.slane %v2269_v63, %v3446_v9  ;;  %v2292_v36 = vrot.slane %v2270_v0, %v3446_v9  ;;  %v2247_v21 = vrot.slane %v3761_v14, %v3426_v51 }
 0x137   :  { %v2299_v10 = vrot.slane %v2271_v2, %v3446_v9  ;;  %v2251_v44 = vrot.slane %v3761_v14, %v3429_v53  ;;  %v2255_v30 = vrot.slane %v3761_v14, %v3432_v54  ;;  %v2259_v28 = vrot.slane %v3761_v14, %v3435_v60 }
 0x138   :  { %v3002_v23 = vcombine.low %v2994_v59, %v3001_v3  ;;  %v2300_v15 = vcombine.low %v2278_v31, %v2285_v11  ;;  %v2263_v16 = vrot.slane %v3761_v14, %v3438_v61  ;;  %v2267_v13 = vrot.slane %v3761_v14, %v3441_v5 }
 0x139   :  { %v2301_v19 = vcombine.low %v2292_v36, %v2299_v10  ;;  %v3003_v20 = vcombine.low %v2239_v45, %v2243_v6  ;;  %v3004_v18 = vcombine.low %v2247_v21, %v2251_v44  ;;  %v3005_v22 = vcombine.low %v2255_v30, %v2259_v28 }
 0x13a   :  { %3095 = vperm.xlu0 %3243, %v3002_v23   ;;  %v2308_v56 = vrot.slane %v2300_v15, %v3446_v9  ;;  %v3006_v4 = vcombine.low %v2263_v16, %v2267_v13  ;;  %v1791_v26 = vrot.slane %v3458_v29, %v3420_v49  ;;  %v1795_v32 = vrot.slane %v3458_v29, %v3423_v50 }
 0x13b   :  { %v2315_v34 = vrot.slane %v2301_v19, %v3446_v9  ;;  %v3013_v39 = vrot.slane %v3003_v20, %v3446_v9  ;;  %v3020_v14 = vrot.slane %v3004_v18, %v3446_v9  ;;  %v3027_v35 = vrot.slane %v3005_v22, %v3446_v9 }
 0x13c   :  { %v3034_v38 = vrot.slane %v3006_v4, %v3446_v9  ;;  %v1799_v40 = vrot.slane %v3458_v29, %v3426_v51  ;;  %v1803_v41 = vrot.slane %v3458_v29, %v3429_v53  ;;  %v1807_v27 = vrot.slane %v3458_v29, %v3432_v54 }
 0x13d   :  { %v2316_v43 = vcombine.low %v2308_v56, %v2315_v34  ;;  %v3035_v46 = vcombine.low %v3013_v39, %v3020_v14  ;;  %v1811_v55 = vrot.slane %v3458_v29, %v3435_v60  ;;  %v1815_v47 = vrot.slane %v3458_v29, %v3438_v61 }
 0x13e   :  { %v3036_v7 = vcombine.low %v3027_v35, %v3034_v38  ;;  %v1819_v24 = vrot.slane %v3458_v29, %v3441_v5  ;;  %v2317_v48 = vcombine.low %v1791_v26, %v1795_v32  ;;  %v2318_v52 = vcombine.low %v1799_v40, %v1803_v41 }
 0x13f   :  { %3053 = vperm.xlu1 %3244, %v2316_v43   ;;  %v3043_v57 = vrot.slane %v3035_v46, %v3446_v9  ;;  %v2319_v12 = vcombine.low %v1807_v27, %v1811_v55  ;;  %v1823_v58 = vrot.slane %v3451_v17, %v3420_v49  ;;  %v1827_v62 = vrot.slane %v3451_v17, %v3423_v50 }
 0x140   :  { %v3050_v59 = vrot.slane %v3036_v7, %v3446_v9  ;;  %v2320_v63 = vcombine.low %v1815_v47, %v1819_v24  ;;  %v2327_v0 = vrot.slane %v2317_v48, %v3446_v9  ;;  %v2334_v2 = vrot.slane %v2318_v52, %v3446_v9 }
 0x141   :  { %v2341_v29 = vrot.slane %v2319_v12, %v3446_v9  ;;  %v1831_v31 = vrot.slane %v3451_v17, %v3426_v51  ;;  %v1835_v45 = vrot.slane %v3451_v17, %v3429_v53  ;;  %v1839_v6 = vrot.slane %v3451_v17, %v3432_v54 }
 0x142   :  { %v3051_v3 = vcombine.low %v3043_v57, %v3050_v59  ;;  %v2348_v11 = vrot.slane %v2320_v63, %v3446_v9  ;;  %v2349_v36 = vcombine.low %v2327_v0, %v2334_v2  ;;  %v1843_v21 = vrot.slane %v3451_v17, %v3435_v60 }
 0x143   :  { %v1847_v10 = vrot.slane %v3451_v17, %v3438_v61  ;;  %v1851_v44 = vrot.slane %v3451_v17, %v3441_v5  ;;  %v2366_v30 = vcombine.low %v1823_v58, %v1827_v62  ;;  %v2367_v28 = vcombine.low %v1831_v31, %v1835_v45 }
 0x144   :  { %3098 = vperm.xlu0 %3243, %v3051_v3   ;;  %v2350_v23 = vcombine.low %v2341_v29, %v2348_v11  ;;  %v2357_v15 = vrot.slane %v2349_v36, %v3446_v9  ;;  %v2368_v16 = vcombine.low %v1839_v6, %v1843_v21  ;;  %v1855_v13 = vrot.slane %v3461_v33, %v3420_v49 }
 0x145   :  { %v2369_v19 = vcombine.low %v1847_v10, %v1851_v44  ;;  %v2376_v20 = vrot.slane %v2366_v30, %v3446_v9  ;;  %v2383_v18 = vrot.slane %v2367_v28, %v3446_v9  ;;  %v1859_v22 = vrot.slane %v3461_v33, %v3423_v50 }
 0x146   :  { %v2364_v17 = vrot.slane %v2350_v23, %v3446_v9  ;;  %v2390_v56 = vrot.slane %v2368_v16, %v3446_v9  ;;  %v1863_v4 = vrot.slane %v3461_v33, %v3426_v51  ;;  %v1867_v26 = vrot.slane %v3461_v33, %v3429_v53 }
 0x147   :  { %v2397_v32 = vrot.slane %v2369_v19, %v3446_v9  ;;  %v2398_v34 = vcombine.low %v2376_v20, %v2383_v18  ;;  %v1871_v39 = vrot.slane %v3461_v33, %v3432_v54  ;;  %v1875_v14 = vrot.slane %v3461_v33, %v3435_v60 }
 0x148   :  { %v2365_v35 = vcombine.low %v2357_v15, %v2364_v17  ;;  %v1879_v38 = vrot.slane %v3461_v33, %v3438_v61  ;;  %v1883_v40 = vrot.slane %v3461_v33, %v3441_v5  ;;  %v2415_v41 = vcombine.low %v1855_v13, %v1859_v22 }
 0x149   :  { %v2399_v27 = vcombine.low %v2390_v56, %v2397_v32  ;;  %v2406_v43 = vrot.slane %v2398_v34, %v3446_v9  ;;  %v2416_v46 = vcombine.low %v1863_v4, %v1867_v26  ;;  %v2417_v55 = vcombine.low %v1871_v39, %v1875_v14 }
 0x14a   :  { %3056 = vperm.xlu1 %3244, %v2365_v35   ;;  %v2418_v47 = vcombine.low %v1879_v38, %v1883_v40  ;;  %v2425_v7 = vrot.slane %v2415_v41, %v3446_v9  ;;  %v687_v24 = vrot.slane %v3657_v8, %v3420_v49  ;;  %v691_v48 = vrot.slane %v3657_v8, %v3423_v50 }
 0x14b   :  { %v2413_v52 = vrot.slane %v2399_v27, %v3446_v9  ;;  %v2432_v33 = vrot.slane %v2416_v46, %v3446_v9  ;;  %v2439_v57 = vrot.slane %v2417_v55, %v3446_v9  ;;  %v695_v12 = vrot.slane %v3657_v8, %v3426_v51 }
 0x14c   :  { %v2446_v58 = vrot.slane %v2418_v47, %v3446_v9  ;;  %v699_v62 = vrot.slane %v3657_v8, %v3429_v53  ;;  %v703_v59 = vrot.slane %v3657_v8, %v3432_v54  ;;  %v707_v63 = vrot.slane %v3657_v8, %v3435_v60 }
 0x14d   :  { %v2414_v0 = vcombine.low %v2406_v43, %v2413_v52  ;;  %v2447_v2 = vcombine.low %v2425_v7, %v2432_v33  ;;  %v711_v29 = vrot.slane %v3657_v8, %v3438_v61  ;;  %v715_v31 = vrot.slane %v3657_v8, %v3441_v5 }
 0x14e   :  { %v2448_v45 = vcombine.low %v2439_v57, %v2446_v58  ;;  %v1417_v6 = vcombine.low %v687_v24, %v691_v48  ;;  %v1418_v3 = vcombine.low %v695_v12, %v699_v62  ;;  %v1419_v11 = vcombine.low %v703_v59, %v707_v63 }
 0x14f   :  { %3059 = vperm.xlu1 %3244, %v2414_v0   ;;  %v2455_v36 = vrot.slane %v2447_v2, %v3446_v9  ;;  %v1420_v21 = vcombine.low %v711_v29, %v715_v31  ;;  %v719_v10 = vrot.slane %v3729_v25, %v3420_v49  ;;  %v723_v44 = vrot.slane %v3729_v25, %v3423_v50  ;;  %v1569_v29 = vpop.permute.xlu1 %1568 }
 0x150   :  { %v2462_v30 = vrot.slane %v2448_v45, %v3446_v9  ;;  %v1427_v28 = vrot.slane %v1417_v6, %v3446_v9  ;;  %v1434_v8 = vrot.slane %v1418_v3, %v3446_v9  ;;  %v1441_v23 = vrot.slane %v1419_v11, %v3446_v9  ;;  %v1566_v11 = vpop.permute.xlu0 %1565 }
 0x151   :  { %v1448_v15 = vrot.slane %v1420_v21, %v3446_v9  ;;  %v727_v16 = vrot.slane %v3729_v25, %v3426_v51  ;;  %v731_v13 = vrot.slane %v3729_v25, %v3429_v53  ;;  %v735_v19 = vrot.slane %v3729_v25, %v3432_v54 }
 0x152   :  { %v2463_v20 = vcombine.low %v2455_v36, %v2462_v30  ;;  %v1449_v18 = vcombine.low %v1427_v28, %v1434_v8  ;;  %v739_v22 = vrot.slane %v3729_v25, %v3435_v60  ;;  %v743_v17 = vrot.slane %v3729_v25, %v3438_v61 }
 0x153   :  { %v1450_v56 = vcombine.low %v1441_v23, %v1448_v15  ;;  %v747_v4 = vrot.slane %v3729_v25, %v3441_v5  ;;  %v1466_v26 = vcombine.low %v719_v10, %v723_v44  ;;  %v1467_v32 = vcombine.low %v727_v16, %v731_v13  ;;  %v1572_v31 = vpop.permute.xlu1 %1571 }
 0x154   :  { %3062 = vperm.xlu1 %3244, %v2463_v20   ;;  %v1457_v34 = vrot.slane %v1449_v18, %v3446_v9  ;;  %v1468_v39 = vcombine.low %v735_v19, %v739_v22  ;;  %v751_v14 = vrot.slane %v3753_v1, %v3420_v49  ;;  %v755_v35 = vrot.slane %v3753_v1, %v3423_v50  ;;  %v4208_v21 = vpop.permute.xlu0 %3065 }
 0x155   :  { %v1464_v38 = vrot.slane %v1450_v56, %v3446_v9  ;;  %v1469_v40 = vcombine.low %v743_v17, %v747_v4  ;;  %v1476_v41 = vrot.slane %v1466_v26, %v3446_v9  ;;  %v1483_v27 = vrot.slane %v1467_v32, %v3446_v9 }
 0x156   :  { %v1490_v25 = vrot.slane %v1468_v39, %v3446_v9  ;;  %v759_v43 = vrot.slane %v3753_v1, %v3426_v51  ;;  %v763_v46 = vrot.slane %v3753_v1, %v3429_v53  ;;  %v767_v49 = vrot.slane %v3753_v1, %v3432_v54 }
 0x157   :  { %v1465_v55 = vcombine.low %v1457_v34, %v1464_v38  ;;  %v1497_v50 = vrot.slane %v1469_v40, %v3446_v9  ;;  %v1498_v47 = vcombine.low %v1476_v41, %v1483_v27  ;;  %v771_v7 = vrot.slane %v3753_v1, %v3435_v60  ;;  %v1575_v45 = vpop.permute.xlu1 %1574 }
 0x158   :  { %v775_v24 = vrot.slane %v3753_v1, %v3438_v61  ;;  %v779_v48 = vrot.slane %v3753_v1, %v3441_v5  ;;  %v1515_v51 = vcombine.low %v751_v14, %v755_v35  ;;  %v1516_v52 = vcombine.low %v759_v43, %v763_v46  ;;  %v4212_v44 = vpop.permute.xlu0 %3068 }
 0x159   :  { %1604 = vperm.xlu1 %3244, %v1465_v55   ;;  %v1499_v53 = vcombine.low %v1490_v25, %v1497_v50  ;;  %v1506_v33 = vrot.slane %v1498_v47, %v3446_v9  ;;  %v1517_v54 = vcombine.low %v767_v49, %v771_v7  ;;  %v4235_v22 = vand.u32 127, %v268_v37 }
 0x15a   :  { %v1518_v57 = vcombine.low %v775_v24, %v779_v48  ;;  %v1525_v12 = vrot.slane %v1515_v51, %v3446_v9  ;;  %v1532_v58 = vrot.slane %v1516_v52, %v3446_v9 }
 0x15b   :  { %v1513_v60 = vrot.slane %v1499_v53, %v3446_v9  ;;  %v1539_v62 = vrot.slane %v1517_v54, %v3446_v9  ;;  %v1578_v6 = vpop.permute.xlu1 %1577  ;;  %v1618_v17 = vadd.s32 4294967288, %v4235_v22  ;;  %v1625_v56 = vadd.s32 4294967280, %v4235_v22 }
 0x15c   :  { %v1546_v61 = vrot.slane %v1518_v57, %v3446_v9  ;;  %v1547_v59 = vcombine.low %v1525_v12, %v1532_v58  ;;  %v1632_v26 = vadd.s32 4294967272, %v4235_v22  ;;  %v1639_v32 = vadd.s32 4294967264, %v4235_v22 }
 0x15d   :  { %v1514_v5 = vcombine.low %v1506_v33, %v1513_v60  ;;  %v1621_v39 = vsub.s32 %v1618_v17, %v3417_v42  ;;  %v1628_v14 = vsub.s32 %v1625_v56, %v3417_v42  ;;  %v1616_v35 = vsub.s32 %v4235_v22, %v3417_v42 }
 0x15e   :  { %v1548_v1 = vcombine.low %v1539_v62, %v1546_v61  ;;  %v1555_v63 = vrot.slane %v1547_v59, %v3446_v9  ;;  %v1635_v37 = vsub.s32 %v1632_v26, %v3417_v42  ;;  %v1642_v38 = vsub.s32 %v1639_v32, %v3417_v42 }
 0x15f   :  { %1607 = vperm.xlu1 %3244, %v1514_v5   ;;  %v1646_v40 = vadd.s32 4294967256, %v4235_v22  ;;  %v1622_v27 = vrot.slane %v1569_v29, %v1621_v39  ;;  %v1629_v25 = vrot.slane %v1572_v31, %v1628_v14  ;;  %v1617_v46 = vrot.slane %v1566_v11, %v1616_v35 }
 0x160   :  { %v1562_v0 = vrot.slane %v1548_v1, %v3446_v9  ;;  %v1636_v49 = vrot.slane %v1575_v45, %v1635_v37  ;;  %v1653_v55 = vadd.s32 4294967248, %v4235_v22  ;;  %v1643_v47 = vrot.slane %v1578_v6, %v1642_v38 }
 0x161   :  { %v4216_v28 = vpop.permute.xlu0 %3071  ;;  %v1649_v50 = vsub.s32 %v1646_v40, %v3417_v42  ;;  %v1660_v7 = vadd.s32 4294967240, %v4235_v22  ;;  %v1624_v24 = vsel %vm1623_vm1, %v1622_v27, %v1617_v46  ;;  %v3122_v48 = vrot.slane %v4208_v21, %v1642_v38 }
 0x162   :  { %v1563_v2 = vcombine.low %v1555_v63, %v1562_v0  ;;  %v1631_v52 = vsel %vm1630_vm2, %v1629_v25, %v1624_v24  ;;  %v1667_v33 = vadd.s32 4294967232, %v4235_v22  ;;  %v1656_v57 = vsub.s32 %v1653_v55, %v3417_v42 }
 0x163   :  { %v3127_v53 = vrot.slane %v4212_v44, %v1649_v50  ;;  %v1638_v54 = vsel %vm1637_vm3, %v1636_v49, %v1631_v52  ;;  %v1674_v12 = vadd.s32 4294967224, %v4235_v22  ;;  %v1663_v62 = vsub.s32 %v1660_v7, %v3417_v42 }
 0x164   :  { %1610 = vperm.xlu1 %3244, %v1563_v2   ;;  %v1645_v60 = vsel %vm1644_vm4, %v1643_v47, %v1638_v54  ;;  %v1681_v61 = vadd.s32 4294967216, %v4235_v22  ;;  %v1688_v1 = vadd.s32 4294967208, %v4235_v22  ;;  %v1695_v63 = vadd.s32 4294967200, %v4235_v22 }
 0x165   :  { %v3132_v2 = vrot.slane %v4216_v28, %v1656_v57  ;;  %v1670_v31 = vsub.s32 %v1667_v33, %v3417_v42  ;;  %v1702_v45 = vadd.s32 4294967192, %v4235_v22  ;;  %v1677_v11 = vsub.s32 %v1674_v12, %v3417_v42 }
 0x166   :  { %v1684_v17 = vsub.s32 %v1681_v61, %v3417_v42  ;;  %v1709_v56 = vadd.s32 4294967184, %v4235_v22  ;;  %v1716_v38 = vadd.s32 4294967176, %v4235_v22 }
 0x167   :  { %v4204_v3 = vpop.permute.xlu1 %1580 }
 0x168   :  { %v1650_v29 = vrot.slane %v4204_v3, %v1649_v50  ;;  %v1691_v3 = vsub.s32 %v1688_v1, %v3417_v42  ;;  %v1712_v46 = vsub.s32 %v1709_v56, %v3417_v42 }
 0x16a   :  { %v1652_v32 = vsel %vm1651_vm5, %v1650_v29, %v1645_v60 }
 0x16d   :  { %v4220_v23 = vpop.permute.xlu0 %3074 }
 0x173   :  { %v4206_v36 = vpop.permute.xlu1 %1583 }
 0x174   :  { %v1657_v27 = vrot.slane %v4206_v36, %v1656_v57 }
 0x179   :  { %v4224_v16 = vpop.permute.xlu0 %3077 }
 0x17a   :  { %v3142_v25 = vrot.slane %v4224_v16, %v1670_v31 }
 0x17f   :  { %v4210_v10 = vpop.permute.xlu1 %1586 }
 0x180   :  { %v1664_v55 = vrot.slane %v4210_v10, %v1663_v62 }
 0x184   :  { %v4228_v19 = vpop.permute.xlu0 %3080 }
 0x185   :  { %v3147_v50 = vrot.slane %v4228_v19, %v1677_v11  ;;  %v1659_v19 = vsel %vm1658_vm6, %v1657_v27, %v1652_v32 }
 0x18a   :  { %v4214_v30 = vpop.permute.xlu1 %1589 }
 0x18b   :  { %v1671_v47 = vrot.slane %v4214_v30, %v1670_v31 }
 0x18f   :  { %v4232_v18 = vpop.permute.xlu0 %3083 }
 0x190   :  { %v3152_v7 = vrot.slane %v4232_v18, %v1684_v17 }
 0x194   :  { %v4218_v8 = vpop.permute.xlu1 %1592 }
 0x195   :  { %v1678_v36 = vrot.slane %v4218_v8, %v1677_v11 }
 0x199   :  { %v4241_v34 = vpop.permute.xlu0 %3086 }
 0x19a   :  { %v3157_v16 = vrot.slane %v4241_v34, %v1691_v3 }
 0x19f   :  { %v4222_v15 = vpop.permute.xlu1 %1595 }
 0x1a4   :  { %v4250_v43 = vpop.permute.xlu0 %3089 }
 0x1a9   :  { %v4226_v13 = vpop.permute.xlu1 %1598 }
 0x1aa   :  { %v1692_v33 = vrot.slane %v4226_v13, %v1691_v3 }
 0x1ae   :  { %v4266_v59 = vpop.permute.xlu0 %3092 }
 0x1b4   :  { %v4230_v20 = vpop.permute.xlu1 %1601 }
 0x1be   :  { %v3054_v4 = vpop.permute.xlu1 %3053 }
 0x1bf   :  { %v3103_v0 = vrot.slane %v3054_v4, %v1616_v35  ;;  %v1698_v4 = vsub.s32 %v1695_v63, %v3417_v42 }
 0x1c1   :  { %v3162_v52 = vrot.slane %v4250_v43, %v1698_v4  ;;  %v1699_v12 = vrot.slane %v4230_v20, %v1698_v4  ;;  %v139_v20 = vld [vmem:[%s4345_s1] sm:$0x1]  ;;  %s3336_s1 = smov [#allocation2]  }
 0x1c2   :  { %v1739_v11 = vsub.f32 1.0, %v139_v20  ;;  %s3222_s14 = sshll.u32 %s3336_s1, 4  ;;  %s3223_s14 = int_to_ptr.vmem [resolvable:$true] %s3222_s14 }
 0x1c3   :  { %s3309_s15 = scalar_lea.vmem %s3223_s14, 16  ;;  %s3313_s16 = scalar_lea.vmem %s3223_s14, 32 }
 0x1c4   :  { %p3310_p0 = scmp.ne.s32.totalorder %s3223_s14, %s3309_s15  ;;  %p3314_p1 = scmp.lt.s32.totalorder %s3223_s14, %s3223_s14 }
 0x1c5   :  { %p3315_p2 = scmp.lt.s32.totalorder %s3313_s16, %s3309_s15 }
 0x1c7   :  { %p3316_p3 = por %p3315_p2, %p3314_p1 }
 0x1c9   :  { %v3057_v41 = vpop.permute.xlu1 %3056  ;;  %p3317_p4 = pnand %p3316_p3, %p3310_p0 }
 0x1ca   :  { %v3107_v58 = vrot.slane %v3057_v41, %v1621_v39  ;;  %v1705_v39 = vsub.s32 %v1702_v45, %v3417_v42 }
 0x1cc   :  { %v3108_v21 = vsel %vm1623_vm1, %v3107_v58, %v3103_v0  ;;  %v3167_v8 = vrot.slane %v4266_v59, %v1705_v39  ;;  %vm3207_vm1 = vcmask 1040384  }
 0x1ce   :  { %v3060_v51 = vpop.permute.xlu1 %3059 }
 0x1cf   :  { %v3112_v5 = vrot.slane %v3060_v51, %v1628_v14  ;;  %v3096_v14 = vpop.permute.xlu0 %3095  ;;  %v1685_v51 = vrot.slane %v4222_v15, %v1684_v17  ;;  %v3201_v17 = vmul.u32 128, %v3417_v42 }
 0x1d0   :  { %v3172_v58 = vrot.slane %v3096_v14, %v1712_v46 }
 0x1d1   :  { %v3113_v28 = vsel %vm1630_vm2, %v3112_v5, %v3108_v21  ;;  %v3204_v4 = vadd.s32 %v3201_v17, %v4235_v22  ;;  %vm72_vm2 = vcmask 0  }
 0x1d3   :  { %v3063_v6 = vpop.permute.xlu1 %3062  ;;  %v3099_v30 = vpop.permute.xlu0 %3098  ;;  %vm3205_vm0 = vcmp.lt.s32.totalorder %v3204_v4, 8 }
 0x1d4   :  { %v3117_v44 = vrot.slane %v3063_v6, %v1635_v37  ;;  %v3137_v37 = vrot.slane %v4220_v23, %v1663_v62 }
 0x1d6   :  { %v3118_v26 = vsel %vm1637_vm3, %v3117_v44, %v3113_v28 }
 0x1d7   :  { %v3123_v35 = vsel %vm1644_vm4, %v3122_v48, %v3118_v26  ;;  %v1719_v48 = vsub.s32 %v1716_v38, %v3417_v42 }
 0x1d8   :  { %v3128_v40 = vsel %vm1651_vm5, %v3127_v53, %v3123_v35  ;;  %v1605_v41 = vpop.permute.xlu1 %1604  ;;  %v1666_v53 = vsel %vm1665_vm7, %v1664_v55, %v1659_v19 }
 0x1d9   :  { %v3133_v49 = vsel %vm1658_vm6, %v3132_v2, %v3128_v40  ;;  %v1673_v57 = vsel %vm1672_vm8, %v1671_v47, %v1666_v53  ;;  %v3177_v60 = vrot.slane %v3099_v30, %v1719_v48  ;;  %v1706_v62 = vrot.slane %v1605_v41, %v1705_v39 }
 0x1da   :  { %v3138_v23 = vsel %vm1665_vm7, %v3137_v37, %v3133_v49  ;;  %v1680_v43 = vsel %vm1679_vm9, %v1678_v36, %v1673_v57  ;;  %v3335_v37 = vmov 0.0  }
 0x1db   :  { %v3143_v24 = vsel %vm1672_vm8, %v3142_v25, %v3138_v23  ;;  %v1687_v13 = vsel %vm1686_vm10, %v1685_v51, %v1680_v43  ;;  %73 = vst.msk [vmem:[#allocation2] sm:$0x1] %vm72_vm2, %v3335_v37 }
 0x1dc   :  { %v3148_v10 = vsel %vm1679_vm9, %v3147_v50, %v3143_v24  ;;  %v1694_v1 = vsel %vm1693_vm11, %v1692_v33, %v1687_v13 }
 0x1dd   :  { %v3153_v18 = vsel %vm1686_vm10, %v3152_v7, %v3148_v10  ;;  %v1701_v0 = vsel %vm1700_vm12, %v1699_v12, %v1694_v1 }
 0x1de   :  { %v3158_v34 = vsel %vm1693_vm11, %v3157_v16, %v3153_v18  ;;  %v1608_v54 = vpop.permute.xlu1 %1607  ;;  %v1708_v31 = vsel %vm1707_vm13, %v1706_v62, %v1701_v0 }
 0x1df   :  { %v3163_v15 = vsel %vm1700_vm12, %v3162_v52, %v3158_v34  ;;  %v1713_v5 = vrot.slane %v1608_v54, %v1712_v46 }
 0x1e0   :  { %v3168_v61 = vsel %vm1707_vm13, %v3167_v8, %v3163_v15 }
 0x1e1   :  { %v3173_v59 = vsel %vm1714_vm14, %v3172_v58, %v3168_v61  ;;  %v1715_v6 = vsel %vm1714_vm14, %v1713_v5, %v1708_v31 }
 0x1e2   :  { %v3178_v63 = vsel %vm1721_vm15, %v3177_v60, %v3173_v59  ;;  %v3212_v38 = vld [vmem:[#allocation2] sm:$0x1] }
 0x1e3   :  { %v1611_v2 = vpop.permute.xlu1 %1610  ;;  %v3185_v29 = vrot.slane %v3178_v63, %v3446_v9 }
 0x1e4   :  { %v1720_v45 = vrot.slane %v1611_v2, %v1719_v48 }
 0x1e5   :  { %v3192_v21 = vrot.slane %v3185_v29, %v3446_v9 }
 0x1e6   :  { %v1722_v44 = vsel %vm1721_vm15, %v1720_v45, %v1715_v6 }
 0x1e7   :  { %v1729_v56 = vrot.slane %v1722_v44, %v3446_v9  ;;  %v3194_v3 = vmul.f32 %v3192_v21, %v1739_v11 }
 0x1e9   :  { %v1736_v28 = vrot.slane %v1729_v56, %v3446_v9 }
 0x1eb   :  { %v1738_v26 = vmul.f32 %v1736_v28, %v139_v20 }
 0x1ed   :  { %v3195_v32 = vadd.f32 %v3194_v3, %v1738_v26 }
 0x1ef   :  { %v3196_v39 = vsub.f32 0.0, %v3195_v32 }
 0x1f1   :  { %v3206_v14 = vsel %vm3205_vm0, %v3196_v39, 0.0 }
 0x1f2   :  { %v3208_v35 = vsel %vm3207_vm1, %v3206_v14, 0.0 }
 0x1f3   :  { %3209 = vadd.xlane.f32.xlu1 %v3208_v35 }
 0x280   :  { %v3210_v42 = vpop.xlane.xlu1 %3209 }
 0x281   :  { %v3213_v40 = vadd.f32 %v3212_v38, %v3210_v42 }
 0x283   :  { %3215 = vst.msk [vmem:[#allocation2] sm:$0x1] %vm72_vm2, %v3213_v40 }
 0x284   :  { %3320 = shalt.err (!%p3317_p4)
}
 0x285   :  { %s3321_s19 = scalar_lea.hbm %s4346_s2, 16 }
 0x286   :  { %p3322_p5 = scmp.ne.s32.totalorder %s4346_s2, %s3321_s19  ;;  %p3325_p6 = scmp.lt.u32.totalorder %s3321_s19, %s4346_s2 }
 0x288   :  { %p3327_p7 = pnand %p3325_p6, %p3322_p5 }
 0x28a   :  { %3330 = shalt.err (!%p3327_p7)
}
 0x28b   :  { %3225 = dma.vmem_to_hbm [thread:$0]  %s3223_s14, 16, %s4346_s2, [#allocation3]  }
 0x28c   :  { %3331 = dma.done.wait [#allocation3], 16  }
 0x28d   :  { %3332 = vsyncadd [#allocation3], 4294967280 }
 0x28e   :  { %3229 = vsyncpa [#allocation3], 1 }

</bundles_post_ra>
